<compile_context>
chip_gen: v5e
topology: v5e:2x2
jax: 0.10.0
libtpu: 0.0.40
codegen_flags: <defaults>
</compile_context>

<pallas_src>
import functools

import jax
import jax.numpy as jnp
from jax import lax
from jax.experimental import pallas as pl
from jax.experimental.pallas import tpu as pltpu

HIDDENS = (500, 400, 300, 200, 100)          # PyTorch module widths
PADDED_HIDDENS = (512, 512, 384, 256, 128)   # lane-aligned widths used in-kernel


def _round_up(x, m):
    return ((x + m - 1) // m) * m


def _choose_tb(B):
    """Adaptive batch tile (static per-jit)."""
    if B <= 128:
        # Tiny-batch / single-query path: pad only to the bf16 sublane pack.
        return max(16, _round_up(B, 16))
    # Throughput path: big lane-aligned tiles, but always >= 2 grid steps so
    # v7x's second TensorCore gets work (harmless serial loop on v5e/v6e).
    return min(1024, _round_up((B + 1) // 2, 128))


def _use_bf16_epilogue():
    """bf16 bias/ReLU only on chips with a bf16-capable VPU (v6e / v7x)."""
    try:
        kind = jax.devices()[0].device_kind.lower()
    except Exception:
        return False
    return any(tag in kind for tag in ("v6", "v7", "7x"))


def _mlp_kernel(x_ref,
                w1_ref, b1_ref, w2_ref, b2_ref, w3_ref, b3_ref,
                w4_ref, b4_ref, w5_ref, b5_ref, w6t_ref, b6_ref,
                out_ref, *, epi_dtype):
    def hidden(h_bf16, w_ref, b_ref):
        # MXU matmul with f32 accumulation; epilogue (bias + ReLU) in
        # epi_dtype (bf16 on v6e/v7x, f32 on v5e); next-layer operand is bf16.
        acc = jnp.dot(h_bf16, w_ref[...], preferred_element_type=jnp.float32)
        h = jnp.maximum(acc.astype(epi_dtype) + b_ref[...], 0)
        return h.astype(jnp.bfloat16)

    h = x_ref[...]                                   # (tb, 128) bf16
    for w_ref, b_ref in ((w1_ref, b1_ref), (w2_ref, b2_ref), (w3_ref, b3_ref),
                         (w4_ref, b4_ref), (w5_ref, b5_ref)):
        h = hidden(h, w_ref, b_ref)

    # Output layer produced directly as a (1, tb) row for a lane-dense store:
    #   o[0, j] = sum_k w6t[0, k] * h[j, k]
    o = lax.dot_general(w6t_ref[...], h,
                        dimension_numbers=(((1,), (1,)), ((), ())),
                        preferred_element_type=jnp.float32)
    out_ref[...] = jnp.tanh(o + b6_ref[...]).astype(out_ref.dtype)


def init_params(key, d_pri, d_pub):
    """Deterministic init matching torch.nn.Linear shapes (weights stored as
    (in_features, out_features))."""
    dims = (d_pri + d_pub,) + HIDDENS + (1,)
    params = []
    for fan_in, fan_out in zip(dims[:-1], dims[1:]):
        key, kw, kb = jax.random.split(key, 3)
        bound = 1.0 / jnp.sqrt(jnp.float32(fan_in))
        w = jax.random.uniform(kw, (fan_in, fan_out), jnp.float32, -bound, bound)
        b = jax.random.uniform(kb, (1, fan_out), jnp.float32, -bound, bound)
        params.append((w, b))
    return params


def _prepare_params(params, d_in_padded, epi_dtype):
    """Zero-pad input/hidden widths to multiples of 128, cast weights to bf16
    (hidden biases to epi_dtype, final bias stays f32), and store the final
    weight transposed as (1, 128)."""
    out_dims = PADDED_HIDDENS + (1,)
    in_dims = (d_in_padded,) + PADDED_HIDDENS
    prepped = []
    for (w, b), din_p, dout_p in zip(params, in_dims, out_dims):
        fan_in, fan_out = w.shape
        w = jnp.pad(w, ((0, din_p - fan_in), (0, dout_p - fan_out)))
        b = jnp.pad(b, ((0, 0), (0, dout_p - fan_out)))
        prepped.append([w, b])
    w6, b6 = prepped[-1]            # w6: (128, 1) after row padding
    prepped[-1] = [w6.T, b6]        # store transposed: (1, 128)

    result = []
    for idx, (w, b) in enumerate(prepped):
        b_dtype = jnp.float32 if idx == len(prepped) - 1 else epi_dtype
        result.append((w.astype(jnp.bfloat16), b.astype(b_dtype)))
    return result


@functools.partial(jax.jit, static_argnames=("tb", "use_bf16_epi"))
def _net_concat_2d(priv, pub, params, tb, use_bf16_epi):
    B, _ = priv.shape
    epi_dtype = jnp.bfloat16 if use_bf16_epi else jnp.float32

    # Fuse the concat at the JAX level: one lane-contiguous input, one matmul.
    x = jnp.concatenate([priv, pub], axis=1).astype(jnp.bfloat16)
    d_in = x.shape[1]
    d_in_p = _round_up(d_in, 128)
    if d_in_p != d_in:
        x = jnp.pad(x, ((0, 0), (0, d_in_p - d_in)))

    ((w1, b1), (w2, b2), (w3, b3),
     (w4, b4), (w5, b5), (w6t, b6)) = _prepare_params(params, d_in_p, epi_dtype)

    Bp = pl.cdiv(B, tb) * tb
    if Bp != B:
        x = jnp.pad(x, ((0, Bp - B), (0, 0)))

    full = lambda a: pl.BlockSpec(a.shape, lambda i: (0, 0))

    out = pl.pallas_call(
        functools.partial(_mlp_kernel, epi_dtype=epi_dtype),
        out_shape=jax.ShapeDtypeStruct((1, Bp), jnp.float32),
        grid_spec=pltpu.PrefetchScalarGridSpec(
            num_scalar_prefetch=0,
            grid=(Bp // tb,),
            in_specs=[
                pl.BlockSpec((tb, d_in_p), lambda i: (i, 0)),
                full(w1), full(b1),
                full(w2), full(b2),
                full(w3), full(b3),
                full(w4), full(b4),
                full(w5), full(b5),
                full(w6t), full(b6),
            ],
            out_specs=pl.BlockSpec((1, tb), lambda i: (0, i)),
        ),
        compiler_params=pltpu.CompilerParams(
            dimension_semantics=("parallel",),
            vmem_limit_bytes=24 * 1024 * 1024),
    )(x, w1, b1, w2, b2, w3, b3, w4, b4, w5, b5, w6t, b6)

    return out[0, :B].reshape(B, 1)


def net_concat(priv, pub, params, tb=None):
    """Matches NetConcat.forward semantics (1D or 2D inputs)."""
    params = tuple(params)
    squeeze = priv.ndim == 1
    if squeeze:
        priv, pub = priv[None, :], pub[None, :]
    B = priv.shape[0]
    if tb is None:
        tb = _choose_tb(B)
    out = _net_concat_2d(priv, pub, params, tb=tb,
                         use_bf16_epi=_use_bf16_epilogue())
    return out[0] if squeeze else out   # (1,) for 1D inputs (like torch), else (B, 1)


def _reference(priv, pub, params):
    joined = jnp.concatenate([priv, pub], axis=-1)
    h = joined
    for i, (w, b) in enumerate(params):
        h = h @ w + b[0]
        h = jnp.maximum(h, 0.0) if i < len(params) - 1 else jnp.tanh(h)
    return h


if __name__ == "__main__":
    d_pri, d_pub, batch = 30, 20, 2
    key = jax.random.PRNGKey(0)
    kp, kq, kparams = jax.random.split(key, 3)

    priv = jax.random.normal(kp, (batch, d_pri), jnp.float32)
    pub = jax.random.normal(kq, (batch, d_pub), jnp.float32)
    params = init_params(kparams, d_pri, d_pub)

    # Small-batch path (B=2 -> tb=16, grid=1).
    out = jax.block_until_ready(net_concat(priv, pub, params))
    ref = _reference(priv, pub, params)
    assert out.shape == (batch, 1), out.shape
    # bf16 weights/activations (and bf16 epilogue on v6e/v7x) -> loosened
    # tolerance vs the f32 reference.
    assert jnp.allclose(out, ref, atol=3e-2), (out, ref)

    # Multi-tile + batch-padding path (B=300 -> tb=256, grid=2).
    kb1, kb2 = jax.random.split(kp)
    priv_b = jax.random.normal(kb1, (300, d_pri), jnp.float32)
    pub_b = jax.random.normal(kb2, (300, d_pub), jnp.float32)
    out_b = jax.block_until_ready(net_concat(priv_b, pub_b, params))
    ref_b = _reference(priv_b, pub_b, params)
    assert out_b.shape == (300, 1), out_b.shape
    assert jnp.allclose(out_b, ref_b, atol=3e-2), float(jnp.abs(out_b - ref_b).max())

    # 1D path (PyTorch concatenates along dim 0; output shape (1,)).
    out1d = jax.block_until_ready(net_concat(priv[0], pub[0], params))
    assert out1d.shape == (1,), out1d.shape
    assert jnp.allclose(out1d, ref[0], atol=3e-2)

    print("KERNEL_OK")
</pallas_src>

<mosaic_0001>
module attributes {stable_mosaic.version = 11 : i64} {
  func.func @_mlp_kernel(%arg0: i32, %arg1: memref<16x128xbf16, #tpu.memory_space<vmem>>, %arg2: memref<128x512xbf16, #tpu.memory_space<vmem>>, %arg3: memref<1x512xf32, #tpu.memory_space<vmem>>, %arg4: memref<512x512xbf16, #tpu.memory_space<vmem>>, %arg5: memref<1x512xf32, #tpu.memory_space<vmem>>, %arg6: memref<512x384xbf16, #tpu.memory_space<vmem>>, %arg7: memref<1x384xf32, #tpu.memory_space<vmem>>, %arg8: memref<384x256xbf16, #tpu.memory_space<vmem>>, %arg9: memref<1x256xf32, #tpu.memory_space<vmem>>, %arg10: memref<256x128xbf16, #tpu.memory_space<vmem>>, %arg11: memref<1x128xf32, #tpu.memory_space<vmem>>, %arg12: memref<1x128xbf16, #tpu.memory_space<vmem>>, %arg13: memref<1x1xf32, #tpu.memory_space<vmem>>, %arg14: memref<1x16xf32, #tpu.memory_space<vmem>>) attributes {dimension_semantics = [#tpu.dimension_semantics<parallel>], iteration_bounds = array<i64: 1>, scalar_prefetch = 0 : i64, scratch_operands = 0 : i64, tpu.core_type = #tpu.core_type<tc>, window_params = [{transform_indices = @transform_0, window_bounds = array<i64: 16, 128>}, {pipeline_mode = #tpu.pipeline_mode<synchronous>, transform_indices = @transform_1, window_bounds = array<i64: 128, 512>}, {pipeline_mode = #tpu.pipeline_mode<synchronous>, transform_indices = @transform_2, window_bounds = array<i64: 1, 512>}, {pipeline_mode = #tpu.pipeline_mode<synchronous>, transform_indices = @transform_3, window_bounds = array<i64: 512, 512>}, {pipeline_mode = #tpu.pipeline_mode<synchronous>, transform_indices = @transform_4, window_bounds = array<i64: 1, 512>}, {pipeline_mode = #tpu.pipeline_mode<synchronous>, transform_indices = @transform_5, window_bounds = array<i64: 512, 384>}, {pipeline_mode = #tpu.pipeline_mode<synchronous>, transform_indices = @transform_6, window_bounds = array<i64: 1, 384>}, {pipeline_mode = #tpu.pipeline_mode<synchronous>, transform_indices = @transform_7, window_bounds = array<i64: 384, 256>}, {pipeline_mode = #tpu.pipeline_mode<synchronous>, transform_indices = @transform_8, window_bounds = array<i64: 1, 256>}, {pipeline_mode = #tpu.pipeline_mode<synchronous>, transform_indices = @transform_9, window_bounds = array<i64: 256, 128>}, {pipeline_mode = #tpu.pipeline_mode<synchronous>, transform_indices = @transform_10, window_bounds = array<i64: 1, 128>}, {pipeline_mode = #tpu.pipeline_mode<synchronous>, transform_indices = @transform_11, window_bounds = array<i64: 1, 128>}, {pipeline_mode = #tpu.pipeline_mode<synchronous>, transform_indices = @transform_12, window_bounds = array<i64: 1, 1>}, {transform_indices = @transform_13, window_bounds = array<i64: 1, 16>}]} {
    %c0 = arith.constant 0 : index
    %c0_0 = arith.constant 0 : index
    %0 = vector.load %arg1[%c0, %c0_0] : memref<16x128xbf16, #tpu.memory_space<vmem>>, vector<16x128xbf16>
    %c0_1 = arith.constant 0 : index
    %c0_2 = arith.constant 0 : index
    %1 = vector.load %arg2[%c0_1, %c0_2] : memref<128x512xbf16, #tpu.memory_space<vmem>>, vector<128x512xbf16>
    %cst = arith.constant dense<0.000000e+00> : vector<16x512xf32>
    %2 = tpu.matmul %0, %1, %cst {dimension_numbers = #tpu.dot_dimension_numbers<[1], [0], [0], [1], [0, 0, 1, 1], [], []>} : vector<16x128xbf16>, vector<128x512xbf16>, vector<16x512xf32> -> vector<16x512xf32>
    %c0_3 = arith.constant 0 : index
    %c0_4 = arith.constant 0 : index
    %3 = vector.load %arg3[%c0_3, %c0_4] : memref<1x512xf32, #tpu.memory_space<vmem>>, vector<1x512xf32>
    %4 = vector.broadcast %3 : vector<1x512xf32> to vector<16x512xf32>
    %5 = arith.addf %2, %4 : vector<16x512xf32>
    %cst_5 = arith.constant 0.000000e+00 : f32
    %6 = vector.broadcast %cst_5 : f32 to vector<16x512xf32>
    %7 = arith.maximumf %5, %6 : vector<16x512xf32>
    %8 = arith.truncf %7 : vector<16x512xf32> to vector<16x512xbf16>
    %c0_6 = arith.constant 0 : index
    %c0_7 = arith.constant 0 : index
    %9 = vector.load %arg4[%c0_6, %c0_7] : memref<512x512xbf16, #tpu.memory_space<vmem>>, vector<512x512xbf16>
    %cst_8 = arith.constant dense<0.000000e+00> : vector<16x512xf32>
    %10 = tpu.matmul %8, %9, %cst_8 {dimension_numbers = #tpu.dot_dimension_numbers<[1], [0], [0], [1], [0, 0, 1, 1], [], []>} : vector<16x512xbf16>, vector<512x512xbf16>, vector<16x512xf32> -> vector<16x512xf32>
    %c0_9 = arith.constant 0 : index
    %c0_10 = arith.constant 0 : index
    %11 = vector.load %arg5[%c0_9, %c0_10] : memref<1x512xf32, #tpu.memory_space<vmem>>, vector<1x512xf32>
    %12 = vector.broadcast %11 : vector<1x512xf32> to vector<16x512xf32>
    %13 = arith.addf %10, %12 : vector<16x512xf32>
    %cst_11 = arith.constant 0.000000e+00 : f32
    %14 = vector.broadcast %cst_11 : f32 to vector<16x512xf32>
    %15 = arith.maximumf %13, %14 : vector<16x512xf32>
    %16 = arith.truncf %15 : vector<16x512xf32> to vector<16x512xbf16>
    %c0_12 = arith.constant 0 : index
    %c0_13 = arith.constant 0 : index
    %17 = vector.load %arg6[%c0_12, %c0_13] : memref<512x384xbf16, #tpu.memory_space<vmem>>, vector<512x384xbf16>
    %cst_14 = arith.constant dense<0.000000e+00> : vector<16x384xf32>
    %18 = tpu.matmul %16, %17, %cst_14 {dimension_numbers = #tpu.dot_dimension_numbers<[1], [0], [0], [1], [0, 0, 1, 1], [], []>} : vector<16x512xbf16>, vector<512x384xbf16>, vector<16x384xf32> -> vector<16x384xf32>
    %c0_15 = arith.constant 0 : index
    %c0_16 = arith.constant 0 : index
    %19 = vector.load %arg7[%c0_15, %c0_16] : memref<1x384xf32, #tpu.memory_space<vmem>>, vector<1x384xf32>
    %20 = vector.broadcast %19 : vector<1x384xf32> to vector<16x384xf32>
    %21 = arith.addf %18, %20 : vector<16x384xf32>
    %cst_17 = arith.constant 0.000000e+00 : f32
    %22 = vector.broadcast %cst_17 : f32 to vector<16x384xf32>
    %23 = arith.maximumf %21, %22 : vector<16x384xf32>
    %24 = arith.truncf %23 : vector<16x384xf32> to vector<16x384xbf16>
    %c0_18 = arith.constant 0 : index
    %c0_19 = arith.constant 0 : index
    %25 = vector.load %arg8[%c0_18, %c0_19] : memref<384x256xbf16, #tpu.memory_space<vmem>>, vector<384x256xbf16>
    %cst_20 = arith.constant dense<0.000000e+00> : vector<16x256xf32>
    %26 = tpu.matmul %24, %25, %cst_20 {dimension_numbers = #tpu.dot_dimension_numbers<[1], [0], [0], [1], [0, 0, 1, 1], [], []>} : vector<16x384xbf16>, vector<384x256xbf16>, vector<16x256xf32> -> vector<16x256xf32>
    %c0_21 = arith.constant 0 : index
    %c0_22 = arith.constant 0 : index
    %27 = vector.load %arg9[%c0_21, %c0_22] : memref<1x256xf32, #tpu.memory_space<vmem>>, vector<1x256xf32>
    %28 = vector.broadcast %27 : vector<1x256xf32> to vector<16x256xf32>
    %29 = arith.addf %26, %28 : vector<16x256xf32>
    %cst_23 = arith.constant 0.000000e+00 : f32
    %30 = vector.broadcast %cst_23 : f32 to vector<16x256xf32>
    %31 = arith.maximumf %29, %30 : vector<16x256xf32>
    %32 = arith.truncf %31 : vector<16x256xf32> to vector<16x256xbf16>
    %c0_24 = arith.constant 0 : index
    %c0_25 = arith.constant 0 : index
    %33 = vector.load %arg10[%c0_24, %c0_25] : memref<256x128xbf16, #tpu.memory_space<vmem>>, vector<256x128xbf16>
    %cst_26 = arith.constant dense<0.000000e+00> : vector<16x128xf32>
    %34 = tpu.matmul %32, %33, %cst_26 {dimension_numbers = #tpu.dot_dimension_numbers<[1], [0], [0], [1], [0, 0, 1, 1], [], []>} : vector<16x256xbf16>, vector<256x128xbf16>, vector<16x128xf32> -> vector<16x128xf32>
    %c0_27 = arith.constant 0 : index
    %c0_28 = arith.constant 0 : index
    %35 = vector.load %arg11[%c0_27, %c0_28] : memref<1x128xf32, #tpu.memory_space<vmem>>, vector<1x128xf32>
    %36 = vector.broadcast %35 : vector<1x128xf32> to vector<16x128xf32>
    %37 = arith.addf %34, %36 : vector<16x128xf32>
    %cst_29 = arith.constant 0.000000e+00 : f32
    %38 = vector.broadcast %cst_29 : f32 to vector<16x128xf32>
    %39 = arith.maximumf %37, %38 : vector<16x128xf32>
    %40 = arith.truncf %39 : vector<16x128xf32> to vector<16x128xbf16>
    %c0_30 = arith.constant 0 : index
    %c0_31 = arith.constant 0 : index
    %41 = vector.load %arg12[%c0_30, %c0_31] : memref<1x128xbf16, #tpu.memory_space<vmem>>, vector<1x128xbf16>
    %cst_32 = arith.constant dense<0.000000e+00> : vector<1x16xf32>
    %42 = tpu.matmul %41, %40, %cst_32 {dimension_numbers = #tpu.dot_dimension_numbers<[1], [1], [0], [0], [0, 0, 1, 0], [], []>} : vector<1x128xbf16>, vector<16x128xbf16>, vector<1x16xf32> -> vector<1x16xf32>
    %c0_33 = arith.constant 0 : index
    %c0_34 = arith.constant 0 : index
    %43 = vector.load %arg13[%c0_33, %c0_34] : memref<1x1xf32, #tpu.memory_space<vmem>>, vector<1x1xf32>
    %44 = vector.broadcast %43 : vector<1x1xf32> to vector<1x16xf32>
    %45 = arith.addf %42, %44 : vector<1x16xf32>
    %46 = math.tanh %45 : vector<1x16xf32>
    %c0_35 = arith.constant 0 : index
    %c0_36 = arith.constant 0 : index
    %47 = vector.load %arg14[%c0_35, %c0_36] : memref<1x16xf32, #tpu.memory_space<vmem>>, vector<1x16xf32>
    tpu.vector_store %arg14[%c0_35, %c0_36], %46 {strides = array<i32>} : memref<1x16xf32, #tpu.memory_space<vmem>>, vector<1x16xf32>,
    return
  }
  func.func @transform_0(%arg0: i32) -> (i32, i32) {
    %c0_i32 = arith.constant 0 : i32
    %c0_i32_0 = arith.constant 0 : i32
    return %arg0, %c0_i32 : i32, i32
  }
  func.func @transform_1(%arg0: i32) -> (i32, i32) {
    %c0_i32 = arith.constant 0 : i32
    %c0_i32_0 = arith.constant 0 : i32
    %c0_i32_1 = arith.constant 0 : i32
    return %c0_i32, %c0_i32_0 : i32, i32
  }
  func.func @transform_2(%arg0: i32) -> (i32, i32) {
    %c0_i32 = arith.constant 0 : i32
    %c0_i32_0 = arith.constant 0 : i32
    %c0_i32_1 = arith.constant 0 : i32
    return %c0_i32, %c0_i32_0 : i32, i32
  }
  func.func @transform_3(%arg0: i32) -> (i32, i32) {
    %c0_i32 = arith.constant 0 : i32
    %c0_i32_0 = arith.constant 0 : i32
    %c0_i32_1 = arith.constant 0 : i32
    return %c0_i32, %c0_i32_0 : i32, i32
  }
  func.func @transform_4(%arg0: i32) -> (i32, i32) {
    %c0_i32 = arith.constant 0 : i32
    %c0_i32_0 = arith.constant 0 : i32
    %c0_i32_1 = arith.constant 0 : i32
    return %c0_i32, %c0_i32_0 : i32, i32
  }
  func.func @transform_5(%arg0: i32) -> (i32, i32) {
    %c0_i32 = arith.constant 0 : i32
    %c0_i32_0 = arith.constant 0 : i32
    %c0_i32_1 = arith.constant 0 : i32
    return %c0_i32, %c0_i32_0 : i32, i32
  }
  func.func @transform_6(%arg0: i32) -> (i32, i32) {
    %c0_i32 = arith.constant 0 : i32
    %c0_i32_0 = arith.constant 0 : i32
    %c0_i32_1 = arith.constant 0 : i32
    return %c0_i32, %c0_i32_0 : i32, i32
  }
  func.func @transform_7(%arg0: i32) -> (i32, i32) {
    %c0_i32 = arith.constant 0 : i32
    %c0_i32_0 = arith.constant 0 : i32
    %c0_i32_1 = arith.constant 0 : i32
    return %c0_i32, %c0_i32_0 : i32, i32
  }
  func.func @transform_8(%arg0: i32) -> (i32, i32) {
    %c0_i32 = arith.constant 0 : i32
    %c0_i32_0 = arith.constant 0 : i32
    %c0_i32_1 = arith.constant 0 : i32
    return %c0_i32, %c0_i32_0 : i32, i32
  }
  func.func @transform_9(%arg0: i32) -> (i32, i32) {
    %c0_i32 = arith.constant 0 : i32
    %c0_i32_0 = arith.constant 0 : i32
    %c0_i32_1 = arith.constant 0 : i32
    return %c0_i32, %c0_i32_0 : i32, i32
  }
  func.func @transform_10(%arg0: i32) -> (i32, i32) {
    %c0_i32 = arith.constant 0 : i32
    %c0_i32_0 = arith.constant 0 : i32
    %c0_i32_1 = arith.constant 0 : i32
    return %c0_i32, %c0_i32_0 : i32, i32
  }
  func.func @transform_11(%arg0: i32) -> (i32, i32) {
    %c0_i32 = arith.constant 0 : i32
    %c0_i32_0 = arith.constant 0 : i32
    %c0_i32_1 = arith.constant 0 : i32
    return %c0_i32, %c0_i32_0 : i32, i32
  }
  func.func @transform_12(%arg0: i32) -> (i32, i32) {
    %c0_i32 = arith.constant 0 : i32
    %c0_i32_0 = arith.constant 0 : i32
    %c0_i32_1 = arith.constant 0 : i32
    return %c0_i32, %c0_i32_0 : i32, i32
  }
  func.func @transform_13(%arg0: i32) -> (i32, i32) {
    %c0_i32 = arith.constant 0 : i32
    %c0_i32_0 = arith.constant 0 : i32
    return %c0_i32, %arg0 : i32, i32
  }
}

</mosaic_0001>

<bundles_post_ra>
// kernel: _net_concat_2d.1
= control target key start
LH: loop header
LB: loop body
LE: loop exit
PB: predicated region body
PF: predicated region fallthrough
CT: control target
= control target key end

     0   :  { %vm2733_vm0 = vcmask 122880   ;;  %s6378_s1 = inlined_call_operand.vmem [shape: bf16[128,512], index: 1, kind: input, shape index: {}]   ;;  %s6379_s3 = inlined_call_operand.vmem [shape: bf16[512,512], index: 3, kind: input, shape index: {}]   ;;  %s6380_s0 = inlined_call_operand.vmem [shape: bf16[16,128], index: 0, kind: input, shape index: {}]   ;;  %s6381_s2 = inlined_call_operand.vmem [shape: f32[1,512], index: 2, kind: input, shape index: {}]   ;;  %s6382_s5 = inlined_call_operand.vmem [shape: bf16[512,384], index: 5, kind: input, shape index: {}]   ;;  %s6383_s4 = inlined_call_operand.vmem [shape: f32[1,512], index: 4, kind: input, shape index: {}]   ;;  %s6384_s7 = inlined_call_operand.vmem [shape: bf16[384,256], index: 7, kind: input, shape index: {}]   ;;  %s6385_s6 = inlined_call_operand.vmem [shape: f32[1,384], index: 6, kind: input, shape index: {}]   ;;  %s6386_s9 = inlined_call_operand.vmem [shape: bf16[256,128], index: 9, kind: input, shape index: {}]   ;;  %s6387_s8 = inlined_call_operand.vmem [shape: f32[1,256], index: 8, kind: input, shape index: {}]   ;;  %s6388_s10 = inlined_call_operand.vmem [shape: f32[1,128], index: 10, kind: input, shape index: {}]   ;;  %s6389_s12 = inlined_call_operand.<no memory space> [shape: f32[1,1], index: 12, kind: input, shape index: {}]   ;;  %s6390_s11 = inlined_call_operand.vmem [shape: bf16[1,128], index: 11, kind: input, shape index: {}]   ;;  %s6391_s13 = inlined_call_operand.vmem [shape: f32[1,16], index: 13, kind: output, shape index: {}]  }
   0x1   :  { %v2857_v0 = vld [vmem:[%s6378_s1 + $0xe0] sm:$0xf]  ;;  %v4054_v1 = vld [vmem:[%s6378_s1 + $0xec] sm:$0xf0]  ;;  %v4052_v2 = vld [vmem:[%s6378_s1 + $0xe4] sm:$0xf] }
   0x2   :  { %v2858_v3 = vor.u32 %v4054_v1, %v2857_v0  ;;  %v2859_v4 = vld [vmem:[%s6378_s1 + $0xf0] sm:$0xf0]  ;;  %v2865_v5 = vld [vmem:[%s6378_s1 + $0xe8] sm:$0xf]  ;;  %v4055_v6 = vld [vmem:[%s6378_s1 + $0xf4] sm:$0xf0] }
   0x3   :  { %v2862_v7 = vor.u32 %v4052_v2, %v2859_v4  ;;  %v2866_v8 = vor.u32 %v4055_v6, %v2865_v5  ;;  %v4053_v9 = vld [vmem:[%s6378_s1 + $0xec] sm:$0xf]  ;;  %v2867_v10 = vld [vmem:[%s6378_s1 + $0xf8] sm:$0xf0]  ;;  %v2841_v11 = vld [vmem:[%s6378_s1 + $0xc0] sm:$0xf] }
   0x4   :  { %257 = vmatpush.bf16.msra.mxu0 %v2858_v3  ;;  %v2870_v12 = vor.u32 %v4053_v9, %v2867_v10  ;;  %v4050_v13 = vld [vmem:[%s6378_s1 + $0xcc] sm:$0xf0]  ;;  %v4048_v14 = vld [vmem:[%s6378_s1 + $0xc4] sm:$0xf]  ;;  %v2843_v15 = vld [vmem:[%s6378_s1 + $0xd0] sm:$0xf0] }
   0x5   :  { %271 = vmatpush.bf16.msra.mxu1 %v2862_v7  ;;  %285 = vmatpush.bf16.msra.mxu2 %v2866_v8  ;;  %v2842_v16 = vor.u32 %v4050_v13, %v2841_v11  ;;  %v2846_v17 = vor.u32 %v4048_v14, %v2843_v15  ;;  %v2849_v18 = vld [vmem:[%s6378_s1 + $0xc8] sm:$0xf]  ;;  %v4051_v19 = vld [vmem:[%s6378_s1 + $0xd4] sm:$0xf0]  ;;  %v4049_v20 = vld [vmem:[%s6378_s1 + $0xcc] sm:$0xf] }
   0x6   :  { %299 = vmatpush.bf16.msra.mxu3 %v2870_v12  ;;  %v2850_v21 = vor.u32 %v4051_v19, %v2849_v18  ;;  %v2851_v22 = vld [vmem:[%s6378_s1 + $0xd8] sm:$0xf0]  ;;  %v2825_v23 = vld [vmem:[%s6378_s1 + $0xa0] sm:$0xf]  ;;  %v4046_v24 = vld [vmem:[%s6378_s1 + $0xac] sm:$0xf0] }
   0x7   :  { %v2854_v25 = vor.u32 %v4049_v20, %v2851_v22  ;;  %v4044_v26 = vld [vmem:[%s6378_s1 + $0xa4] sm:$0xf]  ;;  %v2827_v27 = vld [vmem:[%s6378_s1 + $0xb0] sm:$0xf0]  ;;  %v2833_v28 = vld [vmem:[%s6378_s1 + $0xa8] sm:$0xf]  ;;  %v2826_v29 = vor.u32 %v4046_v24, %v2825_v23 }
   0x8   :  { %258 = vmatpush.bf16.msra.mxu0 %v2842_v16  ;;  %v4047_v30 = vld [vmem:[%s6378_s1 + $0xb4] sm:$0xf0]  ;;  %v4045_v31 = vld [vmem:[%s6378_s1 + $0xac] sm:$0xf]  ;;  %v2835_v32 = vld [vmem:[%s6378_s1 + $0xb8] sm:$0xf0]  ;;  %v2830_v33 = vor.u32 %v4044_v26, %v2827_v27 }
   0x9   :  { %272 = vmatpush.bf16.msra.mxu1 %v2846_v17  ;;  %286 = vmatpush.bf16.msra.mxu2 %v2850_v21  ;;  %v2834_v34 = vor.u32 %v4047_v30, %v2833_v28  ;;  %v2809_v35 = vld [vmem:[%s6378_s1 + $0x80] sm:$0xf]  ;;  %v4042_v36 = vld [vmem:[%s6378_s1 + $0x8c] sm:$0xf0]  ;;  %v4040_v37 = vld [vmem:[%s6378_s1 + $0x84] sm:$0xf]  ;;  %v2838_v38 = vor.u32 %v4045_v31, %v2835_v32 }
   0xa   :  { %300 = vmatpush.bf16.msra.mxu3 %v2854_v25  ;;  %v2811_v39 = vld [vmem:[%s6378_s1 + $0x90] sm:$0xf0]  ;;  %v2817_v40 = vld [vmem:[%s6378_s1 + $0x88] sm:$0xf]  ;;  %v4043_v41 = vld [vmem:[%s6378_s1 + $0x94] sm:$0xf0]  ;;  %v2810_v44 = vor.u32 %v4042_v36, %v2809_v35 }
   0xb   :  { %v4041_v42 = vld [vmem:[%s6378_s1 + $0x8c] sm:$0xf]  ;;  %v2819_v43 = vld [vmem:[%s6378_s1 + $0x98] sm:$0xf0]  ;;  %v2814_v45 = vor.u32 %v4040_v37, %v2811_v39  ;;  %v2818_v46 = vor.u32 %v4043_v41, %v2817_v40  ;;  %v2793_v47 = vld [vmem:[%s6378_s1 + $0x60] sm:$0xf] }
   0xc   :  { %259 = vmatpush.bf16.msra.mxu0 %v2826_v29  ;;  %v4038_v48 = vld [vmem:[%s6378_s1 + $0x6c] sm:$0xf0]  ;;  %v4036_v49 = vld [vmem:[%s6378_s1 + $0x64] sm:$0xf]  ;;  %v2822_v50 = vor.u32 %v4041_v42, %v2819_v43  ;;  %v2795_v51 = vld [vmem:[%s6378_s1 + $0x70] sm:$0xf0] }
   0xd   :  { %273 = vmatpush.bf16.msra.mxu1 %v2830_v33  ;;  %287 = vmatpush.bf16.msra.mxu2 %v2834_v34  ;;  %v2801_v52 = vld [vmem:[%s6378_s1 + $0x68] sm:$0xf]  ;;  %v4039_v53 = vld [vmem:[%s6378_s1 + $0x74] sm:$0xf0]  ;;  %v4037_v54 = vld [vmem:[%s6378_s1 + $0x6c] sm:$0xf]  ;;  %v2794_v56 = vor.u32 %v4038_v48, %v2793_v47  ;;  %v2798_v57 = vor.u32 %v4036_v49, %v2795_v51 }
   0xe   :  { %301 = vmatpush.bf16.msra.mxu3 %v2838_v38  ;;  %v2803_v55 = vld [vmem:[%s6378_s1 + $0x78] sm:$0xf0]  ;;  %v2802_v58 = vor.u32 %v4039_v53, %v2801_v52  ;;  %v2777_v59 = vld [vmem:[%s6378_s1 + $0x40] sm:$0xf]  ;;  %v4034_v60 = vld [vmem:[%s6378_s1 + $0x4c] sm:$0xf0] }
   0xf   :  { %v4032_v61 = vld [vmem:[%s6378_s1 + $0x44] sm:$0xf]  ;;  %v2806_v62 = vor.u32 %v4037_v54, %v2803_v55  ;;  %v2779_v63 = vld [vmem:[%s6378_s1 + $0x50] sm:$0xf0]  ;;  %v2785_v0 = vld [vmem:[%s6378_s1 + $0x48] sm:$0xf]  ;;  %v2778_v4 = vor.u32 %v4034_v60, %v2777_v59 }
  0x10   :  { %260 = vmatpush.bf16.msra.mxu0 %v2810_v44  ;;  %v4035_v1 = vld [vmem:[%s6378_s1 + $0x54] sm:$0xf0]  ;;  %v4033_v2 = vld [vmem:[%s6378_s1 + $0x4c] sm:$0xf]  ;;  %v2787_v3 = vld [vmem:[%s6378_s1 + $0x58] sm:$0xf0]  ;;  %v2782_v5 = vor.u32 %v4032_v61, %v2779_v63 }
  0x11   :  { %274 = vmatpush.bf16.msra.mxu1 %v2814_v45  ;;  %288 = vmatpush.bf16.msra.mxu2 %v2818_v46  ;;  %v2786_v6 = vor.u32 %v4035_v1, %v2785_v0  ;;  %v2761_v7 = vld [vmem:[%s6378_s1 + $0x20] sm:$0xf]  ;;  %v4030_v8 = vld [vmem:[%s6378_s1 + $0x2c] sm:$0xf0]  ;;  %v4028_v9 = vld [vmem:[%s6378_s1 + $0x24] sm:$0xf]  ;;  %v2790_v10 = vor.u32 %v4033_v2, %v2787_v3 }
  0x12   :  { %302 = vmatpush.bf16.msra.mxu3 %v2822_v50  ;;  %v2763_v11 = vld [vmem:[%s6378_s1 + $0x30] sm:$0xf0]  ;;  %v2769_v12 = vld [vmem:[%s6378_s1 + $0x28] sm:$0xf]  ;;  %v4031_v13 = vld [vmem:[%s6378_s1 + $0x34] sm:$0xf0]  ;;  %v2762_v16 = vor.u32 %v4030_v8, %v2761_v7 }
  0x13   :  { %v4029_v14 = vld [vmem:[%s6378_s1 + $0x2c] sm:$0xf]  ;;  %v2771_v15 = vld [vmem:[%s6378_s1 + $0x38] sm:$0xf0]  ;;  %v2745_v17 = vld [vmem:[%s6378_s1] sm:$0xf]  ;;  %v2766_v18 = vor.u32 %v4028_v9, %v2763_v11  ;;  %v2770_v19 = vor.u32 %v4031_v13, %v2769_v12 }
  0x14   :  { %261 = vmatpush.bf16.msra.mxu0 %v2794_v56  ;;  %v4026_v20 = vld [vmem:[%s6378_s1 + $0xc] sm:$0xf0]  ;;  %v4024_v21 = vld [vmem:[%s6378_s1 + $0x4] sm:$0xf]  ;;  %v2747_v22 = vld [vmem:[%s6378_s1 + $0x10] sm:$0xf0]  ;;  %v2774_v23 = vor.u32 %v4029_v14, %v2771_v15 }
  0x15   :  { %275 = vmatpush.bf16.msra.mxu1 %v2798_v57  ;;  %289 = vmatpush.bf16.msra.mxu2 %v2802_v58  ;;  %v2753_v24 = vld [vmem:[%s6378_s1 + $0x8] sm:$0xf]  ;;  %v4027_v25 = vld [vmem:[%s6378_s1 + $0x14] sm:$0xf0]  ;;  %v4025_v26 = vld [vmem:[%s6378_s1 + $0xc] sm:$0xf]  ;;  %v2746_v30 = vor.u32 %v4026_v20, %v2745_v17  ;;  %v2750_v33 = vor.u32 %v4024_v21, %v2747_v22 }
  0x16   :  { %303 = vmatpush.bf16.msra.mxu3 %v2806_v62  ;;  %v2755_v27 = vld [vmem:[%s6378_s1 + $0x18] sm:$0xf0]  ;;  %v2985_v28 = vld [vmem:[%s6379_s3 + $0xe0] sm:$0xf]  ;;  %v4086_v29 = vld [vmem:[%s6379_s3 + $0xec] sm:$0xf0]  ;;  %v2754_v34 = vor.u32 %v4027_v25, %v2753_v24 }
  0x17   :  { %v3113_v31 = vld [vmem:[%s6379_s3 + $0x1e0] sm:$0xf]  ;;  %v4118_v32 = vld [vmem:[%s6379_s3 + $0x1ec] sm:$0xf0]  ;;  %v2758_v36 = vor.u32 %v4025_v26, %v2755_v27  ;;  %v2986_v37 = vor.u32 %v4086_v29, %v2985_v28 }
  0x18   :  { %262 = vmatpush.bf16.msra.mxu0 %v2778_v4  ;;  %v4023_v35 = vld [vmem:[%s6380_s0] sm:$0xff]  ;;  %v4150_v40 = vld [vmem:[%s6379_s3 + $0x2ec] sm:$0xf0]  ;;  %v3114_v41 = vor.u32 %v4118_v32, %v3113_v31 }
  0x19   :  { %276 = vmatpush.bf16.msra.mxu1 %v2782_v5  ;;  %290 = vmatpush.bf16.msra.mxu2 %v2786_v6  ;;  %v2969_v38 = vld [vmem:[%s6379_s3 + $0xc0] sm:$0xf]  ;;  %v4082_v42 = vld [vmem:[%s6379_s3 + $0xcc] sm:$0xf0] }
  0x1a   :  { %304 = vmatpush.bf16.msra.mxu3 %v2790_v10  ;;  %v3241_v39 = vld [vmem:[%s6379_s3 + $0x2e0] sm:$0xf]  ;;  %v4182_v44 = vld [vmem:[%s6379_s3 + $0x3ec] sm:$0xf0]  ;;  %v2970_v48 = vor.u32 %v4082_v42, %v2969_v38 }
  0x1b   :  { %v3369_v43 = vld [vmem:[%s6379_s3 + $0x3e0] sm:$0xf]  ;;  %v4114_v46 = vld [vmem:[%s6379_s3 + $0x1cc] sm:$0xf0]  ;;  %v3242_v47 = vor.u32 %v4150_v40, %v3241_v39 }
  0x1c   :  { %263 = vmatpush.bf16.msra.mxu0 %v2762_v16  ;;  %v3097_v45 = vld [vmem:[%s6379_s3 + $0x1c0] sm:$0xf]  ;;  %v3370_v49 = vor.u32 %v4182_v44, %v3369_v43  ;;  %v4146_v52 = vld [vmem:[%s6379_s3 + $0x2cc] sm:$0xf0] }
  0x1d   :  { %277 = vmatpush.bf16.msra.mxu1 %v2766_v18  ;;  %291 = vmatpush.bf16.msra.mxu2 %v2770_v19  ;;  %v2953_v50 = vld [vmem:[%s6379_s3 + $0xa0] sm:$0xf]  ;;  %v3098_v53 = vor.u32 %v4114_v46, %v3097_v45  ;;  %v4078_v54 = vld [vmem:[%s6379_s3 + $0xac] sm:$0xf0] }
  0x1e   :  { %305 = vmatpush.bf16.msra.mxu3 %v2774_v23  ;;  %v3225_v51 = vld [vmem:[%s6379_s3 + $0x2c0] sm:$0xf]  ;;  %v4178_v56 = vld [vmem:[%s6379_s3 + $0x3cc] sm:$0xf0]  ;;  %v2954_v60 = vor.u32 %v4078_v54, %v2953_v50 }
  0x1f   :  { %v3353_v55 = vld [vmem:[%s6379_s3 + $0x3c0] sm:$0xf]  ;;  %v4110_v58 = vld [vmem:[%s6379_s3 + $0x1ac] sm:$0xf0]  ;;  %v3226_v59 = vor.u32 %v4146_v52, %v3225_v51 }
  0x20   :  { %264 = vmatpush.bf16.msra.mxu0 %v2746_v30  ;;  %v3081_v57 = vld [vmem:[%s6379_s3 + $0x1a0] sm:$0xf]  ;;  %v3354_v61 = vor.u32 %v4178_v56, %v3353_v55  ;;  %v4142_v0 = vld [vmem:[%s6379_s3 + $0x2ac] sm:$0xf0]  ;;  %v4084_v55 = vld [vmem:[%s6379_s3 + $0xe4] sm:$0xf] }
  0x21   :  { %278 = vmatpush.bf16.msra.mxu1 %v2750_v33  ;;  %292 = vmatpush.bf16.msra.mxu2 %v2754_v34  ;;  %v2937_v62 = vld [vmem:[%s6379_s3 + $0x80] sm:$0xf]  ;;  %v3082_v1 = vor.u32 %v4110_v58, %v3081_v57  ;;  %v4074_v2 = vld [vmem:[%s6379_s3 + $0x8c] sm:$0xf0]  ;;  %v2987_v56 = vld [vmem:[%s6379_s3 + $0xf0] sm:$0xf0] }
  0x22   :  { %306 = vmatpush.bf16.msra.mxu3 %v2758_v36  ;;  %v3209_v63 = vld [vmem:[%s6379_s3 + $0x2a0] sm:$0xf]  ;;  %v4174_v4 = vld [vmem:[%s6379_s3 + $0x3ac] sm:$0xf0]  ;;  %v2938_v8 = vor.u32 %v4074_v2, %v2937_v62  ;;  %v4116_v57 = vld [vmem:[%s6379_s3 + $0x1e4] sm:$0xf] }
  0x23   :  { %265 = vmatmul.bf16.vlgmr.msra.gmra.mxu0 %v4023_v35  ;;  %v3337_v3 = vld [vmem:[%s6379_s3 + $0x3a0] sm:$0xf]  ;;  %v4106_v6 = vld [vmem:[%s6379_s3 + $0x18c] sm:$0xf0]  ;;  %v3210_v7 = vor.u32 %v4142_v0, %v3209_v63  ;;  %v3115_v58 = vld [vmem:[%s6379_s3 + $0x1f0] sm:$0xf0] }
  0x24   :  { %1103 = vmatpush.bf16.msrb.mxu0 %v2986_v37  ;;  %279 = vmatmul.bf16.vlgmr.msra.gmra.mxu1 %v4023_v35  ;;  %v3065_v5 = vld [vmem:[%s6379_s3 + $0x180] sm:$0xf]  ;;  %v3338_v9 = vor.u32 %v4174_v4, %v3337_v3  ;;  %v4138_v12 = vld [vmem:[%s6379_s3 + $0x28c] sm:$0xf0]  ;;  %v4080_v62 = vld [vmem:[%s6379_s3 + $0xc4] sm:$0xf]  ;;  %v2990_v3 = vor.u32 %v4084_v55, %v2987_v56 }
  0x25   :  { %1117 = vmatpush.bf16.msrb.mxu1 %v3114_v41  ;;  %293 = vmatmul.bf16.vlgmr.msra.gmra.mxu2 %v4023_v35  ;;  %v2921_v10 = vld [vmem:[%s6379_s3 + $0x60] sm:$0xf]  ;;  %v3066_v13 = vor.u32 %v4106_v6, %v3065_v5  ;;  %v4070_v14 = vld [vmem:[%s6379_s3 + $0x6c] sm:$0xf0]  ;;  %v4148_v5 = vld [vmem:[%s6379_s3 + $0x2e4] sm:$0xf] }
  0x26   :  { %307 = vmatmul.bf16.vlgmr.msra.gmra.mxu3 %v4023_v35  ;;  %1131 = vmatpush.bf16.msrb.mxu2 %v3242_v47  ;;  %v3193_v11 = vld [vmem:[%s6379_s3 + $0x280] sm:$0xf]  ;;  %v4170_v16 = vld [vmem:[%s6379_s3 + $0x38c] sm:$0xf0]  ;;  %v2922_v20 = vor.u32 %v4070_v14, %v2921_v10  ;;  %v3243_v6 = vld [vmem:[%s6379_s3 + $0x2f0] sm:$0xf0] }
  0x27   :  { %1145 = vmatpush.bf16.msrb.mxu3 %v3370_v49  ;;  %v3321_v15 = vld [vmem:[%s6379_s3 + $0x380] sm:$0xf]  ;;  %v4102_v18 = vld [vmem:[%s6379_s3 + $0x16c] sm:$0xf0]  ;;  %v3194_v19 = vor.u32 %v4138_v12, %v3193_v11  ;;  %v3371_v10 = vld [vmem:[%s6379_s3 + $0x3f0] sm:$0xf0] }
  0x28   :  { %1104 = vmatpush.bf16.msrb.mxu0 %v2970_v48  ;;  %v3049_v17 = vld [vmem:[%s6379_s3 + $0x160] sm:$0xf]  ;;  %v3322_v21 = vor.u32 %v4170_v16, %v3321_v15  ;;  %v4134_v24 = vld [vmem:[%s6379_s3 + $0x26c] sm:$0xf0]  ;;  %v4112_v11 = vld [vmem:[%s6379_s3 + $0x1c4] sm:$0xf]  ;;  %v3246_v15 = vor.u32 %v4148_v5, %v3243_v6 }
  0x29   :  { %1118 = vmatpush.bf16.msrb.mxu1 %v3098_v53  ;;  %v2905_v22 = vld [vmem:[%s6379_s3 + $0x40] sm:$0xf]  ;;  %v3050_v25 = vor.u32 %v4102_v18, %v3049_v17  ;;  %v4066_v26 = vld [vmem:[%s6379_s3 + $0x4c] sm:$0xf0]  ;;  %v3099_v12 = vld [vmem:[%s6379_s3 + $0x1d0] sm:$0xf0] }
  0x2a   :  { %1132 = vmatpush.bf16.msrb.mxu2 %v3226_v59  ;;  %v3177_v23 = vld [vmem:[%s6379_s3 + $0x260] sm:$0xf]  ;;  %v4166_v28 = vld [vmem:[%s6379_s3 + $0x36c] sm:$0xf0]  ;;  %v2906_v32 = vor.u32 %v4066_v26, %v2905_v22  ;;  %v4076_v18 = vld [vmem:[%s6379_s3 + $0xa4] sm:$0xf] }
  0x2b   :  { %1146 = vmatpush.bf16.msrb.mxu3 %v3354_v61  ;;  %v3305_v27 = vld [vmem:[%s6379_s3 + $0x360] sm:$0xf]  ;;  %v4098_v30 = vld [vmem:[%s6379_s3 + $0x14c] sm:$0xf0]  ;;  %v3178_v31 = vor.u32 %v4134_v24, %v3177_v23  ;;  %v2955_v22 = vld [vmem:[%s6379_s3 + $0xb0] sm:$0xf0] }
  0x2c   :  { %1105 = vmatpush.bf16.msrb.mxu0 %v2954_v60  ;;  %v3033_v29 = vld [vmem:[%s6379_s3 + $0x140] sm:$0xf]  ;;  %v3306_v33 = vor.u32 %v4166_v28, %v3305_v27  ;;  %v4130_v36 = vld [vmem:[%s6379_s3 + $0x24c] sm:$0xf0]  ;;  %v4176_v23 = vld [vmem:[%s6379_s3 + $0x3c4] sm:$0xf]  ;;  %v2958_v28 = vor.u32 %v4076_v18, %v2955_v22 }
  0x2d   :  { %1119 = vmatpush.bf16.msrb.mxu1 %v3082_v1  ;;  %v2889_v34 = vld [vmem:[%s6379_s3 + $0x20] sm:$0xf]  ;;  %v3034_v37 = vor.u32 %v4098_v30, %v3033_v29  ;;  %v4062_v38 = vld [vmem:[%s6379_s3 + $0x2c] sm:$0xf0]  ;;  %v3355_v24 = vld [vmem:[%s6379_s3 + $0x3d0] sm:$0xf0] }
  0x2e   :  { %1133 = vmatpush.bf16.msrb.mxu2 %v3210_v7  ;;  %v3161_v35 = vld [vmem:[%s6379_s3 + $0x240] sm:$0xf]  ;;  %v4162_v40 = vld [vmem:[%s6379_s3 + $0x34c] sm:$0xf0]  ;;  %v2890_v45 = vor.u32 %v4062_v38, %v2889_v34  ;;  %v3118_v7 = vor.u32 %v4116_v57, %v3115_v58  ;;  %v3083_v26 = vld [vmem:[%s6379_s3 + $0x1b0] sm:$0xf0]  ;;  %v3358_v29 = vor.u32 %v4176_v23, %v3355_v24 }
  0x2f   :  { %1147 = vmatpush.bf16.msrb.mxu3 %v3338_v9  ;;  %v3289_v39 = vld [vmem:[%s6379_s3 + $0x340] sm:$0xf]  ;;  %v4094_v42 = vld [vmem:[%s6379_s3 + $0x12c] sm:$0xf0]  ;;  %v3162_v43 = vor.u32 %v4130_v36, %v3161_v35  ;;  %v4180_v9 = vld [vmem:[%s6379_s3 + $0x3e4] sm:$0xf] }
  0x30   :  { %1106 = vmatpush.bf16.msrb.mxu0 %v2938_v8  ;;  %v3017_v41 = vld [vmem:[%s6379_s3 + $0x120] sm:$0xf]  ;;  %v3290_v46 = vor.u32 %v4162_v40, %v3289_v39  ;;  %v4058_v47 = vld [vmem:[%s6379_s3 + $0xc] sm:$0xf0]  ;;  %v2971_v8 = vld [vmem:[%s6379_s3 + $0xd0] sm:$0xf0]  ;;  %v3374_v17 = vor.u32 %v4180_v9, %v3371_v10 }
  0x31   :  { %1120 = vmatpush.bf16.msrb.mxu1 %v3066_v13  ;;  %v2873_v44 = vld [vmem:[%s6379_s3] sm:$0xf]  ;;  %v4126_v49 = vld [vmem:[%s6379_s3 + $0x22c] sm:$0xf0]  ;;  %v3018_v50 = vor.u32 %v4094_v42, %v3017_v41  ;;  %v2974_v16 = vor.u32 %v4080_v62, %v2971_v8  ;;  %v3067_v34 = vld [vmem:[%s6379_s3 + $0x190] sm:$0xf0] }
  0x32   :  { %1134 = vmatpush.bf16.msrb.mxu2 %v3194_v19  ;;  %v3145_v48 = vld [vmem:[%s6379_s3 + $0x220] sm:$0xf]  ;;  %v4158_v53 = vld [vmem:[%s6379_s3 + $0x32c] sm:$0xf0]  ;;  %v2874_v60 = vor.u32 %v4058_v47, %v2873_v44  ;;  %v4144_v19 = vld [vmem:[%s6379_s3 + $0x2c4] sm:$0xf] }
  0x33   :  { %1148 = vmatpush.bf16.msrb.mxu3 %v3322_v21  ;;  %v3001_v51 = vld [vmem:[%s6379_s3 + $0x100] sm:$0xf]  ;;  %v4090_v54 = vld [vmem:[%s6379_s3 + $0x10c] sm:$0xf0]  ;;  %v3146_v59 = vor.u32 %v4126_v49, %v3145_v48  ;;  %v3102_v21 = vor.u32 %v4112_v11, %v3099_v12  ;;  %v3211_v38 = vld [vmem:[%s6379_s3 + $0x2b0] sm:$0xf0] }
  0x34   :  { %1107 = vmatpush.bf16.msrb.mxu0 %v2922_v20  ;;  %v3273_v52 = vld [vmem:[%s6379_s3 + $0x320] sm:$0xf]  ;;  %v4122_v0 = vld [vmem:[%s6379_s3 + $0x20c] sm:$0xf0]  ;;  %v3002_v2 = vor.u32 %v4090_v54, %v3001_v51  ;;  %v3227_v20 = vld [vmem:[%s6379_s3 + $0x2d0] sm:$0xf0] }
  0x35   :  { %1121 = vmatpush.bf16.msrb.mxu1 %v3050_v25  ;;  %v3274_v61 = vor.u32 %v4158_v53, %v3273_v52  ;;  %v3129_v63 = vld [vmem:[%s6379_s3 + $0x200] sm:$0xf]  ;;  %v4154_v4 = vld [vmem:[%s6379_s3 + $0x30c] sm:$0xf0]  ;;  %v4108_v25 = vld [vmem:[%s6379_s3 + $0x1a4] sm:$0xf]  ;;  %v3230_v27 = vor.u32 %v4144_v19, %v3227_v20 }
  0x36   :  { %1135 = vmatpush.bf16.msrb.mxu2 %v3178_v31  ;;  %v3257_v1 = vld [vmem:[%s6379_s3 + $0x300] sm:$0xf]  ;;  %v3130_v13 = vor.u32 %v4122_v0, %v3129_v63  ;;  %v3086_v30 = vor.u32 %v4108_v25, %v3083_v26  ;;  %v4072_v31 = vld [vmem:[%s6379_s3 + $0x84] sm:$0xf]  ;;  %v3339_v41 = vld [vmem:[%s6379_s3 + $0x3b0] sm:$0xf0] }
  0x37   :  { %1149 = vmatpush.bf16.msrb.mxu3 %v3306_v33  ;;  %v3258_v14 = vor.u32 %v4154_v4, %v3257_v1  ;;  %v4104_v33 = vld [vmem:[%s6379_s3 + $0x184] sm:$0xf]  ;;  %v2923_v44 = vld [vmem:[%s6379_s3 + $0x70] sm:$0xf0] }
  0x38   :  { %1108 = vmatpush.bf16.msrb.mxu0 %v2906_v32  ;;  %v2939_v32 = vld [vmem:[%s6379_s3 + $0x90] sm:$0xf0]  ;;  %v3070_v36 = vor.u32 %v4104_v33, %v3067_v34  ;;  %v4172_v39 = vld [vmem:[%s6379_s3 + $0x3a4] sm:$0xf]  ;;  %v81_v33 = vld [vmem:[%s6381_s2] sm:$0xf] }
  0x39   :  { %1122 = vmatpush.bf16.msrb.mxu1 %v3034_v37  ;;  %v2942_v35 = vor.u32 %v4072_v31, %v2939_v32  ;;  %v4140_v37 = vld [vmem:[%s6379_s3 + $0x2a4] sm:$0xf]  ;;  %v3342_v42 = vor.u32 %v4172_v39, %v3339_v41  ;;  %v3051_v47 = vld [vmem:[%s6379_s3 + $0x170] sm:$0xf0] }
  0x3a   :  { %1136 = vmatpush.bf16.msrb.mxu2 %v3162_v43  ;;  %v3214_v40 = vor.u32 %v4140_v37, %v3211_v38  ;;  %v4068_v43 = vld [vmem:[%s6379_s3 + $0x64] sm:$0xf]  ;;  %v3323_v53 = vld [vmem:[%s6379_s3 + $0x390] sm:$0xf0]  ;;  %v84_v37 = vperm.slane %v81_v33, 1 }
  0x3b   :  { %1150 = vmatpush.bf16.msrb.mxu3 %v3290_v46  ;;  %v2926_v46 = vor.u32 %v4068_v43, %v2923_v44  ;;  %v4136_v49 = vld [vmem:[%s6379_s3 + $0x284] sm:$0xf]  ;;  %v2907_v56 = vld [vmem:[%s6379_s3 + $0x50] sm:$0xf0] }
  0x3c   :  { %1109 = vmatpush.bf16.msrb.mxu0 %v2890_v45  ;;  %v4100_v45 = vld [vmem:[%s6379_s3 + $0x164] sm:$0xf]  ;;  %v3179_v62 = vld [vmem:[%s6379_s3 + $0x270] sm:$0xf0] }
  0x3d   :  { %1123 = vmatpush.bf16.msrb.mxu1 %v3018_v50  ;;  %v3054_v48 = vor.u32 %v4100_v45, %v3051_v47  ;;  %v3195_v50 = vld [vmem:[%s6379_s3 + $0x290] sm:$0xf0]  ;;  %v4168_v52 = vld [vmem:[%s6379_s3 + $0x384] sm:$0xf]  ;;  %v4087_v47 = vld [vmem:[%s6379_s3 + $0xf4] sm:$0xf0] }
  0x3e   :  { %1137 = vmatpush.bf16.msrb.mxu2 %v3146_v59  ;;  %v3198_v51 = vor.u32 %v4136_v49, %v3195_v50  ;;  %v3326_v54 = vor.u32 %v4168_v52, %v3323_v53  ;;  %v4064_v55 = vld [vmem:[%s6379_s3 + $0x44] sm:$0xf]  ;;  %v3035_v59 = vld [vmem:[%s6379_s3 + $0x150] sm:$0xf0]  ;;  %v85_v49 = vperm.slane %v81_v33, 2  ;;  %v86_v53 = vperm.slane %v81_v33, 3 }
  0x3f   :  { %1151 = vmatpush.bf16.msrb.mxu3 %v3274_v61  ;;  %v4096_v57 = vld [vmem:[%s6379_s3 + $0x144] sm:$0xf]  ;;  %v2910_v58 = vor.u32 %v4064_v55, %v2907_v56  ;;  %v3307_v1 = vld [vmem:[%s6379_s3 + $0x370] sm:$0xf0]  ;;  %v4119_v52 = vld [vmem:[%s6379_s3 + $0x1f4] sm:$0xf0] }
  0x40   :  { %1110 = vmatpush.bf16.msrb.mxu0 %v2874_v60  ;;  %v3038_v60 = vor.u32 %v4096_v57, %v3035_v59  ;;  %v4132_v61 = vld [vmem:[%s6379_s3 + $0x264] sm:$0xf]  ;;  %v2891_v4 = vld [vmem:[%s6379_s3 + $0x30] sm:$0xf0]  ;;  %v2977_v59 = vld [vmem:[%s6379_s3 + $0xc8] sm:$0xf] }
  0x41   :  { %1124 = vmatpush.bf16.msrb.mxu1 %v3002_v2  ;;  %v4164_v63 = vld [vmem:[%s6379_s3 + $0x364] sm:$0xf]  ;;  %v3182_v0 = vor.u32 %v4132_v61, %v3179_v62  ;;  %v3163_v10 = vld [vmem:[%s6379_s3 + $0x250] sm:$0xf0] }
  0x42   :  { %1138 = vmatpush.bf16.msrb.mxu2 %v3130_v13  ;;  %v3310_v2 = vor.u32 %v4164_v63, %v3307_v1  ;;  %v4092_v6 = vld [vmem:[%s6379_s3 + $0x124] sm:$0xf]  ;;  %v3291_v13 = vld [vmem:[%s6379_s3 + $0x350] sm:$0xf0]  ;;  %v3105_v63 = vld [vmem:[%s6379_s3 + $0x1c8] sm:$0xf] }
  0x43   :  { %1152 = vmatpush.bf16.msrb.mxu3 %v3258_v14  ;;  %v4128_v9 = vld [vmem:[%s6379_s3 + $0x244] sm:$0xf]  ;;  %v3003_v19 = vld [vmem:[%s6379_s3 + $0x110] sm:$0xf0] }
  0x44   :  { %1159 = vmatpush.bf16.msra.mxu0 %v2990_v3  ;;  %v4060_v3 = vld [vmem:[%s6379_s3 + $0x24] sm:$0xf]  ;;  %v3166_v12 = vor.u32 %v4128_v9, %v3163_v10  ;;  %v3147_v22 = vld [vmem:[%s6379_s3 + $0x230] sm:$0xf0] }
  0x45   :  { %1173 = vmatpush.bf16.msra.mxu1 %v3118_v7  ;;  %v2894_v5 = vor.u32 %v4060_v3, %v2891_v4  ;;  %v3019_v7 = vld [vmem:[%s6379_s3 + $0x130] sm:$0xf0]  ;;  %v4160_v11 = vld [vmem:[%s6379_s3 + $0x344] sm:$0xf] }
  0x46   :  { %1187 = vmatpush.bf16.msra.mxu2 %v3246_v15  ;;  %v3022_v8 = vor.u32 %v4092_v6, %v3019_v7  ;;  %v3294_v14 = vor.u32 %v4160_v11, %v3291_v13  ;;  %v4056_v15 = vld [vmem:[%s6379_s3 + $0x4] sm:$0xf]  ;;  %v3275_v24 = vld [vmem:[%s6379_s3 + $0x330] sm:$0xf0]  ;;  %v3249_v6 = vld [vmem:[%s6379_s3 + $0x2e8] sm:$0xf] }
  0x47   :  { %1201 = vmatpush.bf16.msra.mxu3 %v3374_v17  ;;  %v4088_v17 = vld [vmem:[%s6379_s3 + $0x104] sm:$0xf]  ;;  %v3259_v31 = vld [vmem:[%s6379_s3 + $0x310] sm:$0xf0]  ;;  %v4151_v7 = vld [vmem:[%s6379_s3 + $0x2f4] sm:$0xf0] }
  0x48   :  { %1160 = vmatpush.bf16.msra.mxu0 %v2974_v16  ;;  %v2875_v16 = vld [vmem:[%s6379_s3 + $0x10] sm:$0xf0]  ;;  %v3006_v20 = vor.u32 %v4088_v17, %v3003_v19  ;;  %v4156_v23 = vld [vmem:[%s6379_s3 + $0x324] sm:$0xf]  ;;  %v4183_v11 = vld [vmem:[%s6379_s3 + $0x3f4] sm:$0xf0] }
  0x49   :  { %1174 = vmatpush.bf16.msra.mxu1 %v3102_v21  ;;  %v2878_v18 = vor.u32 %v4056_v15, %v2875_v16  ;;  %v4124_v21 = vld [vmem:[%s6379_s3 + $0x224] sm:$0xf]  ;;  %v3278_v26 = vor.u32 %v4156_v23, %v3275_v24  ;;  %v4079_v13 = vld [vmem:[%s6379_s3 + $0xb4] sm:$0xf0]  ;;  %v3089_v16 = vld [vmem:[%s6379_s3 + $0x1a8] sm:$0xf] }
  0x4a   :  { %1188 = vmatpush.bf16.msra.mxu2 %v3230_v27  ;;  %v3150_v25 = vor.u32 %v4124_v21, %v3147_v22  ;;  %v4120_v27 = vld [vmem:[%s6379_s3 + $0x204] sm:$0xf]  ;;  %v4111_v17 = vld [vmem:[%s6379_s3 + $0x1b4] sm:$0xf0]  ;;  %v3233_v24 = vld [vmem:[%s6379_s3 + $0x2c8] sm:$0xf] }
  0x4b   :  { %1202 = vmatpush.bf16.msra.mxu3 %v3358_v29 }
  0x4c   :  { %1161 = vmatpush.bf16.msra.mxu0 %v2958_v28  ;;  %v3131_v28 = vld [vmem:[%s6379_s3 + $0x210] sm:$0xf0] }
  0x4d   :  { %1175 = vmatpush.bf16.msra.mxu1 %v3086_v30  ;;  %v3134_v29 = vor.u32 %v4120_v27, %v3131_v28  ;;  %v4152_v30 = vld [vmem:[%s6379_s3 + $0x304] sm:$0xf]  ;;  %v3090_v28 = vor.u32 %v4111_v17, %v3089_v16  ;;  %v2881_v16 = vld [vmem:[%s6379_s3 + $0x8] sm:$0xf]  ;;  %v4059_v17 = vld [vmem:[%s6379_s3 + $0x14] sm:$0xf0] }
  0x4e   :  { %1189 = vmatpush.bf16.msra.mxu2 %v3214_v40  ;;  %v3262_v32 = vor.u32 %v4152_v30, %v3259_v31  ;;  %v2945_v30 = vld [vmem:[%s6379_s3 + $0x88] sm:$0xf]  ;;  %v4075_v31 = vld [vmem:[%s6379_s3 + $0x94] sm:$0xf0] }
  0x4f   :  { %1203 = vmatpush.bf16.msra.mxu3 %v3342_v42 }
  0x50   :  { %1162 = vmatpush.bf16.msra.mxu0 %v2942_v35  ;;  %v83_v35 = vperm.slane %v81_v33, 0  ;;  %v4107_v33 = vld [vmem:[%s6379_s3 + $0x194] sm:$0xf0] }
  0x51   :  { %1176 = vmatpush.bf16.msra.mxu1 %v3070_v36 }
  0x52   :  { %1190 = vmatpush.bf16.msra.mxu2 %v3198_v51  ;;  %v3121_v51 = vld [vmem:[%s6379_s3 + $0x1e8] sm:$0xf] }
  0x53   :  { %1204 = vmatpush.bf16.msra.mxu3 %v3326_v54 }
  0x54   :  { %1163 = vmatpush.bf16.msra.mxu0 %v2926_v46  ;;  %v2993_v46 = vld [vmem:[%s6379_s3 + $0xe8] sm:$0xf] }
  0x55   :  { %1177 = vmatpush.bf16.msra.mxu1 %v3054_v48  ;;  %v2994_v56 = vor.u32 %v4087_v47, %v2993_v46 }
  0x56   :  { %1191 = vmatpush.bf16.msra.mxu2 %v3182_v0  ;;  %v4115_v0 = vld [vmem:[%s6379_s3 + $0x1d4] sm:$0xf0] }
  0x57   :  { %1205 = vmatpush.bf16.msra.mxu3 %v3310_v2  ;;  %v3106_v10 = vor.u32 %v4115_v0, %v3105_v63  ;;  %v4135_v63 = vld [vmem:[%s6379_s3 + $0x274] sm:$0xf0] }
  0x58   :  { %1164 = vmatpush.bf16.msra.mxu0 %v2910_v58  ;;  %v3122_v58 = vor.u32 %v4119_v52, %v3121_v51  ;;  %v3329_v52 = vld [vmem:[%s6379_s3 + $0x388] sm:$0xf] }
  0x59   :  { %1178 = vmatpush.bf16.msra.mxu1 %v3038_v60  ;;  %v4083_v60 = vld [vmem:[%s6379_s3 + $0xd4] sm:$0xf0] }
  0x5a   :  { %1192 = vmatpush.bf16.msra.mxu2 %v3166_v12  ;;  %v2961_v12 = vld [vmem:[%s6379_s3 + $0xa8] sm:$0xf] }
  0x5b   :  { %1206 = vmatpush.bf16.msra.mxu3 %v3294_v14  ;;  %v2962_v23 = vor.u32 %v4079_v13, %v2961_v12  ;;  %v3297_v12 = vld [vmem:[%s6379_s3 + $0x348] sm:$0xf] }
  0x5c   :  { %1165 = vmatpush.bf16.msra.mxu0 %v2894_v5  ;;  %v2978_v5 = vor.u32 %v4083_v60, %v2977_v59 }
  0x5d   :  { %1179 = vmatpush.bf16.msra.mxu1 %v3022_v8  ;;  %v3377_v8 = vld [vmem:[%s6379_s3 + $0x3e8] sm:$0xf] }
  0x5e   :  { %1193 = vmatpush.bf16.msra.mxu2 %v3150_v25  ;;  %v3378_v22 = vor.u32 %v4183_v11, %v3377_v8  ;;  %v4147_v25 = vld [vmem:[%s6379_s3 + $0x2d4] sm:$0xf0] }
  0x5f   :  { %1207 = vmatpush.bf16.msra.mxu3 %v3278_v26  ;;  %v3361_v26 = vld [vmem:[%s6379_s3 + $0x3c8] sm:$0xf]  ;;  %v4131_v11 = vld [vmem:[%s6379_s3 + $0x254] sm:$0xf0] }
  0x60   :  { %1166 = vmatpush.bf16.msra.mxu0 %v2878_v18 }
  0x61   :  { %1180 = vmatpush.bf16.msra.mxu1 %v3006_v20  ;;  %v3250_v20 = vor.u32 %v4151_v7, %v3249_v6  ;;  %v3025_v6 = vld [vmem:[%s6379_s3 + $0x128] sm:$0xf]  ;;  %v4095_v7 = vld [vmem:[%s6379_s3 + $0x134] sm:$0xf0] }
  0x62   :  { %1194 = vmatpush.bf16.msra.mxu2 %v3134_v29  ;;  %v4179_v29 = vld [vmem:[%s6379_s3 + $0x3d4] sm:$0xf0] }
  0x63   :  { %1208 = vmatpush.bf16.msra.mxu3 %v3262_v32  ;;  %v3073_v32 = vld [vmem:[%s6379_s3 + $0x188] sm:$0xf] }
  0xa0   :  { %v266_v34 = vpop.f32.mrf.mxu0 }
  0xa1   :  { %v280_v36 = vpop.f32.mrf.mxu1  ;;  %v267_v38 = vadd.f32 %v266_v34, %v83_v35  ;;  %v3234_v34 = vor.u32 %v4147_v25, %v3233_v24  ;;  %v4117_v24 = vld [vmem:[%s6379_s3 + $0x1ec] sm:$0xf]  ;;  %v3123_v25 = vld [vmem:[%s6379_s3 + $0x1f8] sm:$0xf0] }
  0xa2   :  { %v281_v39 = vadd.f32 %v280_v36, %v84_v37  ;;  %v2946_v36 = vor.u32 %v4075_v31, %v2945_v30  ;;  %v2882_v30 = vor.u32 %v4059_v17, %v2881_v16  ;;  %v4069_v16 = vld [vmem:[%s6379_s3 + $0x6c] sm:$0xf]  ;;  %v2931_v17 = vld [vmem:[%s6379_s3 + $0x78] sm:$0xf0] }
  0xa3   :  { %v313_v43 = vmax.f32 %v267_v38, 0.0  ;;  %v4143_v38 = vld [vmem:[%s6379_s3 + $0x2b4] sm:$0xf0] }
  0xa4   :  { %v314_v48 = vmax.f32 %v281_v39, 0.0  ;;  %v3074_v39 = vor.u32 %v4107_v33, %v3073_v32  ;;  %v3281_v32 = vld [vmem:[%s6379_s3 + $0x328] sm:$0xf]  ;;  %v4159_v33 = vld [vmem:[%s6379_s3 + $0x334] sm:$0xf0] }
  0xa8   :  { %v294_v40 = vpop.f32.mrf.mxu2  ;;  %v268_v42 = vpop.f32.mrf.mxu0 }
  0xa9   :  { %v308_v41 = vpop.f32.mrf.mxu3  ;;  %v269_v44 = vadd.f32 %v268_v42, %v83_v35  ;;  %v282_v45 = vpop.f32.mrf.mxu1  ;;  %v295_v61 = vadd.f32 %v294_v40, %v85_v49  ;;  %v3362_v35 = vor.u32 %v4179_v29, %v3361_v26  ;;  %v3345_v40 = vld [vmem:[%s6379_s3 + $0x3a8] sm:$0xf]  ;;  %v4127_v29 = vld [vmem:[%s6379_s3 + $0x234] sm:$0xf0] }
  0xaa   :  { %v283_v50 = vadd.f32 %v282_v45, %v84_v37  ;;  %v309_v1 = vadd.f32 %v308_v41, %v86_v53  ;;  %v3217_v37 = vld [vmem:[%s6379_s3 + $0x2a8] sm:$0xf]  ;;  %v4175_v41 = vld [vmem:[%s6379_s3 + $0x3b4] sm:$0xf0] }
  0xab   :  { %v317_v54 = vmax.f32 %v269_v44, 0.0  ;;  %v315_v14 = vmax.f32 %v295_v61, 0.0  ;;  %v2929_v42 = vld [vmem:[%s6379_s3 + $0x68] sm:$0xf]  ;;  %v4103_v45 = vld [vmem:[%s6379_s3 + $0x174] sm:$0xf0]  ;;  %v3218_v46 = vor.u32 %v4143_v38, %v3217_v37  ;;  %v3346_v47 = vor.u32 %v4175_v41, %v3345_v40 }
  0xac   :  { %v318_v55 = vmax.f32 %v283_v50, 0.0  ;;  %v316_v18 = vmax.f32 %v309_v1, 0.0  ;;  %v3057_v44 = vld [vmem:[%s6379_s3 + $0x168] sm:$0xf]  ;;  %v2979_v38 = vld [vmem:[%s6379_s3 + $0xd8] sm:$0xf0]  ;;  %v3282_v41 = vor.u32 %v4159_v33, %v3281_v32 }
  0xad   :  { %v5014_v57 = vpack.c.bf16 %v317_v54, %v313_v43  ;;  %v4071_v43 = vld [vmem:[%s6379_s3 + $0x74] sm:$0xf0]  ;;  %v3058_v51 = vor.u32 %v4103_v45, %v3057_v44  ;;  %v2913_v54 = vld [vmem:[%s6379_s3 + $0x48] sm:$0xf]  ;;  %v3107_v40 = vld [vmem:[%s6379_s3 + $0x1d8] sm:$0xf0] }
  0xae   :  { %v5022_v62 = vpack.c.bf16 %v318_v55, %v314_v48  ;;  %v3201_v48 = vld [vmem:[%s6379_s3 + $0x288] sm:$0xf]  ;;  %v2930_v50 = vor.u32 %v4071_v43, %v2929_v42  ;;  %v4067_v55 = vld [vmem:[%s6379_s3 + $0x54] sm:$0xf0]  ;;  %v4097_v32 = vld [vmem:[%s6379_s3 + $0x14c] sm:$0xf] }
  0xaf   :  { %1111 = vmatmul.bf16.vlgmr.msrb.gmra.mxu0 %v5014_v57  ;;  %v3185_v61 = vld [vmem:[%s6379_s3 + $0x268] sm:$0xf]  ;;  %v2914_v0 = vor.u32 %v4067_v55, %v2913_v54  ;;  %v4123_v43 = vld [vmem:[%s6379_s3 + $0x214] sm:$0xf0]  ;;  %v2963_v54 = vld [vmem:[%s6379_s3 + $0xb8] sm:$0xf0] }
  0xb0   :  { %v296_v2 = vpop.f32.mrf.mxu2  ;;  %1125 = vmatmul.bf16.vlgmr.msrb.gmra.mxu1 %v5022_v62  ;;  %1215 = vmatpush.bf16.msrb.mxu0 %v2994_v56  ;;  %v3041_v56 = vld [vmem:[%s6379_s3 + $0x148] sm:$0xf]  ;;  %v3186_v8 = vor.u32 %v4135_v63, %v3185_v61  ;;  %v4155_v45 = vld [vmem:[%s6379_s3 + $0x314] sm:$0xf0]  ;;  %v4109_v55 = vld [vmem:[%s6379_s3 + $0x1ac] sm:$0xf] }
  0xb1   :  { %v297_v3 = vadd.f32 %v296_v2, %v85_v49  ;;  %v310_v4 = vpop.f32.mrf.mxu3  ;;  %1229 = vmatpush.bf16.msrb.mxu1 %v3122_v58  ;;  %v4139_v49 = vld [vmem:[%s6379_s3 + $0x294] sm:$0xf0]  ;;  %v3313_v2 = vld [vmem:[%s6379_s3 + $0x368] sm:$0xf]  ;;  %v4145_v61 = vld [vmem:[%s6379_s3 + $0x2cc] sm:$0xf] }
  0xb2   :  { %v311_v9 = vadd.f32 %v310_v4, %v86_v53  ;;  %v4171_v53 = vld [vmem:[%s6379_s3 + $0x394] sm:$0xf0]  ;;  %v3202_v59 = vor.u32 %v4139_v49, %v3201_v48  ;;  %v2897_v4 = vld [vmem:[%s6379_s3 + $0x28] sm:$0xf]  ;;  %v3235_v63 = vld [vmem:[%s6379_s3 + $0x2d8] sm:$0xf0] }
  0xb3   :  { %v319_v15 = vmax.f32 %v297_v3, 0.0  ;;  %v4099_v58 = vld [vmem:[%s6379_s3 + $0x154] sm:$0xf0]  ;;  %v3330_v60 = vor.u32 %v4171_v53, %v3329_v52  ;;  %v3137_v42 = vld [vmem:[%s6379_s3 + $0x208] sm:$0xf] }
  0xb4   :  { %v320_v19 = vmax.f32 %v311_v9, 0.0  ;;  %1216 = vmatpush.bf16.msrb.mxu0 %v2978_v5  ;;  %v3042_v1 = vor.u32 %v4099_v58, %v3041_v56  ;;  %v4167_v3 = vld [vmem:[%s6379_s3 + $0x374] sm:$0xf0]  ;;  %v3265_v44 = vld [vmem:[%s6379_s3 + $0x308] sm:$0xf]  ;;  %v3138_v53 = vor.u32 %v4123_v43, %v3137_v42 }
  0xb5   :  { %v5056_v21 = vpack.c.bf16 %v319_v15, %v315_v14  ;;  %1230 = vmatpush.bf16.msrb.mxu1 %v3106_v10  ;;  %v4063_v5 = vld [vmem:[%s6379_s3 + $0x34] sm:$0xf0]  ;;  %v3314_v9 = vor.u32 %v4167_v3, %v3313_v2  ;;  %v3169_v10 = vld [vmem:[%s6379_s3 + $0x248] sm:$0xf]  ;;  %v3026_v14 = vor.u32 %v4095_v7, %v3025_v6  ;;  %v4077_v52 = vld [vmem:[%s6379_s3 + $0xac] sm:$0xf]  ;;  %v3266_v58 = vor.u32 %v4155_v45, %v3265_v44 }
  0xb6   :  { %v5067_v27 = vpack.c.bf16 %v320_v19, %v316_v18  ;;  %v2898_v13 = vor.u32 %v4063_v5, %v2897_v4  ;;  %v4163_v15 = vld [vmem:[%s6379_s3 + $0x354] sm:$0xf0]  ;;  %v3009_v18 = vld [vmem:[%s6379_s3 + $0x108] sm:$0xf]  ;;  %v3091_v56 = vld [vmem:[%s6379_s3 + $0x1b8] sm:$0xf0] }
  0xb7   :  { %1139 = vmatmul.bf16.vlgmr.msrb.gmra.mxu2 %v5056_v21  ;;  %v4091_v19 = vld [vmem:[%s6379_s3 + $0x114] sm:$0xf0]  ;;  %v3298_v26 = vor.u32 %v4163_v15, %v3297_v12  ;;  %v4177_v2 = vld [vmem:[%s6379_s3 + $0x3cc] sm:$0xf]  ;;  %v3363_v3 = vld [vmem:[%s6379_s3 + $0x3d8] sm:$0xf0] }
  0xb8   :  { %1153 = vmatmul.bf16.vlgmr.msrb.gmra.mxu3 %v5067_v27  ;;  %1243 = vmatpush.bf16.msrb.mxu2 %v3250_v20  ;;  %v4085_v20 = vld [vmem:[%s6379_s3 + $0xec] sm:$0xf]  ;;  %v3010_v31 = vor.u32 %v4091_v19, %v3009_v18  ;;  %v2947_v5 = vld [vmem:[%s6379_s3 + $0x98] sm:$0xf0] }
  0xb9   :  { %1257 = vmatpush.bf16.msrb.mxu3 %v3378_v22  ;;  %1217 = vmatpush.bf16.msrb.mxu0 %v2962_v23  ;;  %v3170_v22 = vor.u32 %v4131_v11, %v3169_v10  ;;  %v2995_v23 = vld [vmem:[%s6379_s3 + $0xf8] sm:$0xf0]  ;;  %v4073_v4 = vld [vmem:[%s6379_s3 + $0x8c] sm:$0xf] }
  0xba   :  { %1231 = vmatpush.bf16.msrb.mxu1 %v3090_v28  ;;  %v3153_v28 = vld [vmem:[%s6379_s3 + $0x228] sm:$0xf]  ;;  %v4105_v6 = vld [vmem:[%s6379_s3 + $0x18c] sm:$0xf]  ;;  %v3075_v7 = vld [vmem:[%s6379_s3 + $0x198] sm:$0xf0]  ;;  %v2950_v12 = vor.u32 %v4073_v4, %v2947_v5 }
  0xbb   :  { %v3154_v37 = vor.u32 %v4127_v29, %v3153_v28  ;;  %v4141_v10 = vld [vmem:[%s6379_s3 + $0x2ac] sm:$0xf]  ;;  %v3219_v11 = vld [vmem:[%s6379_s3 + $0x2b8] sm:$0xf0] }
  0xbc   :  { %1244 = vmatpush.bf16.msrb.mxu2 %v3234_v34  ;;  %v2998_v34 = vor.u32 %v4085_v20, %v2995_v23  ;;  %v3347_v15 = vld [vmem:[%s6379_s3 + $0x3b8] sm:$0xf0]  ;;  %v4101_v18 = vld [vmem:[%s6379_s3 + $0x16c] sm:$0xf]  ;;  %v3222_v20 = vor.u32 %v4141_v10, %v3219_v11 }
  0xbd   :  { %1258 = vmatpush.bf16.msrb.mxu3 %v3362_v35  ;;  %1218 = vmatpush.bf16.msrb.mxu0 %v2946_v36  ;;  %v3126_v35 = vor.u32 %v4117_v24, %v3123_v25  ;;  %v4081_v36 = vld [vmem:[%s6379_s3 + $0xcc] sm:$0xf]  ;;  %v3059_v19 = vld [vmem:[%s6379_s3 + $0x178] sm:$0xf0]  ;;  %v2934_v25 = vor.u32 %v4069_v16, %v2931_v17 }
  0xbe   :  { %1232 = vmatpush.bf16.msrb.mxu1 %v3074_v39  ;;  %v4113_v39 = vld [vmem:[%s6379_s3 + $0x1cc] sm:$0xf]  ;;  %v2982_v48 = vor.u32 %v4081_v36, %v2979_v38  ;;  %v3203_v24 = vld [vmem:[%s6379_s3 + $0x298] sm:$0xf0] }
  0xbf   :  { %1167 = vmatmul.bf16.vlgmr.msra.gmra.mxu0 %v5014_v57  ;;  %v3110_v49 = vor.u32 %v4113_v39, %v3107_v40  ;;  %v4137_v23 = vld [vmem:[%s6379_s3 + $0x28c] sm:$0xf]  ;;  %v3331_v29 = vld [vmem:[%s6379_s3 + $0x398] sm:$0xf0] }
  0xc0   :  { %1245 = vmatpush.bf16.msrb.mxu2 %v3218_v46  ;;  %1181 = vmatmul.bf16.vlgmr.msra.gmra.mxu1 %v5022_v62  ;;  %v4149_v46 = vld [vmem:[%s6379_s3 + $0x2ec] sm:$0xf]  ;;  %v3043_v33 = vld [vmem:[%s6379_s3 + $0x158] sm:$0xf0] }
  0xc1   :  { %1259 = vmatpush.bf16.msrb.mxu3 %v3346_v47  ;;  %1219 = vmatpush.bf16.msrb.mxu0 %v2930_v50  ;;  %v3251_v47 = vld [vmem:[%s6379_s3 + $0x2f8] sm:$0xf0]  ;;  %v4181_v50 = vld [vmem:[%s6379_s3 + $0x3ec] sm:$0xf]  ;;  %v3046_v39 = vor.u32 %v4097_v32, %v3043_v33 }
  0xc2   :  { %1233 = vmatpush.bf16.msrb.mxu1 %v3058_v51  ;;  %v3379_v51 = vld [vmem:[%s6379_s3 + $0x3f8] sm:$0xf0]  ;;  %v4169_v28 = vld [vmem:[%s6379_s3 + $0x38c] sm:$0xf] }
  0xc3   :  { %v4133_v36 = vld [vmem:[%s6379_s3 + $0x26c] sm:$0xf]  ;;  %v2899_v43 = vld [vmem:[%s6379_s3 + $0x38] sm:$0xf0] }
  0xc4   :  { %1246 = vmatpush.bf16.msrb.mxu2 %v3202_v59  ;;  %v3254_v59 = vor.u32 %v4149_v46, %v3251_v47  ;;  %v4165_v40 = vld [vmem:[%s6379_s3 + $0x36c] sm:$0xf]  ;;  %v3027_v45 = vld [vmem:[%s6379_s3 + $0x138] sm:$0xf0] }
  0xc5   :  { %1260 = vmatpush.bf16.msrb.mxu3 %v3330_v60  ;;  %1220 = vmatpush.bf16.msrb.mxu0 %v2914_v0  ;;  %v3382_v60 = vor.u32 %v4181_v50, %v3379_v51  ;;  %v2966_v0 = vor.u32 %v4077_v52, %v2963_v54  ;;  %v4061_v42 = vld [vmem:[%s6379_s3 + $0x2c] sm:$0xf]  ;;  %v3139_v17 = vld [vmem:[%s6379_s3 + $0x218] sm:$0xf0] }
  0xc6   :  { %1234 = vmatpush.bf16.msrb.mxu1 %v3042_v1  ;;  %v3094_v1 = vor.u32 %v4109_v55, %v3091_v56  ;;  %v4093_v44 = vld [vmem:[%s6379_s3 + $0x12c] sm:$0xf]  ;;  %v2902_v51 = vor.u32 %v4061_v42, %v2899_v43  ;;  %v2883_v55 = vld [vmem:[%s6379_s3 + $0x18] sm:$0xf0]  ;;  %v3529_v42 = vld [vmem:[%s6382_s5 + $0x120] sm:$0xf] }
  0xc7   :  { %1195 = vmatmul.bf16.vlgmr.msra.gmra.mxu2 %v5056_v21  ;;  %v4161_v50 = vld [vmem:[%s6379_s3 + $0x34c] sm:$0xf]  ;;  %v3030_v52 = vor.u32 %v4093_v44, %v3027_v45 }
  0xc8   :  { %1209 = vmatmul.bf16.vlgmr.msra.gmra.mxu3 %v5067_v27  ;;  %1247 = vmatpush.bf16.msrb.mxu2 %v3186_v8  ;;  %v3238_v8 = vor.u32 %v4145_v61, %v3235_v63  ;;  %v4057_v54 = vld [vmem:[%s6379_s3 + $0xc] sm:$0xf]  ;;  %v4206_v61 = vld [vmem:[%s6382_s5 + $0xb0] sm:$0xf0]  ;;  %v3565_v63 = vld [vmem:[%s6382_s5 + $0x168] sm:$0xf] }
  0xc9   :  { %1261 = vmatpush.bf16.msrb.mxu3 %v3314_v9  ;;  %1221 = vmatpush.bf16.msrb.mxu0 %v2898_v13  ;;  %v3366_v9 = vor.u32 %v4177_v2, %v3363_v3  ;;  %v3078_v13 = vor.u32 %v4105_v6, %v3075_v7  ;;  %v4089_v56 = vld [vmem:[%s6379_s3 + $0x10c] sm:$0xf]  ;;  %v3155_v3 = vld [vmem:[%s6379_s3 + $0x238] sm:$0xf0]  ;;  %v2886_v4 = vor.u32 %v4057_v54, %v2883_v55  ;;  %v4202_v54 = vld [vmem:[%s6382_s5 + $0x94] sm:$0xf] }
  0xca   :  { %1235 = vmatpush.bf16.msrb.mxu1 %v3026_v14  ;;  %v4173_v14 = vld [vmem:[%s6379_s3 + $0x3ac] sm:$0xf]  ;;  %v3283_v7 = vld [vmem:[%s6379_s3 + $0x338] sm:$0xf0]  ;;  %v3459_v55 = vld [vmem:[%s6382_s5 + $0x9c] sm:$0xf0] }
  0xcb   :  { %v4125_v2 = vld [vmem:[%s6379_s3 + $0x22c] sm:$0xf] }
  0xcc   :  { %1248 = vmatpush.bf16.msrb.mxu2 %v3170_v22  ;;  %v3350_v22 = vor.u32 %v4173_v14, %v3347_v15  ;;  %v4157_v6 = vld [vmem:[%s6379_s3 + $0x32c] sm:$0xf]  ;;  %v3158_v11 = vor.u32 %v4125_v2, %v3155_v3  ;;  %v4227_v14 = vld [vmem:[%s6382_s5 + $0x158] sm:$0xf0]  ;;  %v3447_v2 = vld [vmem:[%s6382_s5 + $0x84] sm:$0xf0] }
  0xcd   :  { %1262 = vmatpush.bf16.msrb.mxu3 %v3298_v26  ;;  %1222 = vmatpush.bf16.msrb.mxu0 %v2882_v30  ;;  %v3062_v26 = vor.u32 %v4101_v18, %v3059_v19  ;;  %v4065_v30 = vld [vmem:[%s6379_s3 + $0x4c] sm:$0xf]  ;;  %v3286_v15 = vor.u32 %v4157_v6, %v3283_v7  ;;  %v3267_v19 = vld [vmem:[%s6379_s3 + $0x318] sm:$0xf0]  ;;  %v4212_v6 = vld [vmem:[%s6382_s5 + $0xe0] sm:$0xf0] }
  0xce   :  { %1236 = vmatpush.bf16.msrb.mxu1 %v3010_v31  ;;  %v2915_v31 = vld [vmem:[%s6379_s3 + $0x58] sm:$0xf0]  ;;  %v4121_v16 = vld [vmem:[%s6379_s3 + $0x20c] sm:$0xf]  ;;  %v3637_v7 = vld [vmem:[%s6382_s5 + $0x1f8] sm:$0xf] }
  0xcf   :  { %v2918_v38 = vor.u32 %v4065_v30, %v2915_v31  ;;  %v4153_v18 = vld [vmem:[%s6379_s3 + $0x30c] sm:$0xf]  ;;  %v3433_v31 = vld [vmem:[%s6382_s5 + $0x60] sm:$0xf] }
  0xd0   :  { %1249 = vmatpush.bf16.msrb.mxu2 %v3154_v37  ;;  %1223 = vmatmul.bf16.vlgmr.msrb.gmra.mxu0 %v5014_v57  ;;  %v3187_v37 = vld [vmem:[%s6379_s3 + $0x278] sm:$0xf0]  ;;  %v4221_v44 = vld [vmem:[%s6382_s5 + $0x128] sm:$0xf0] }
  0xd1   :  { %1271 = vmatpush.bf16.msra.mxu0 %v2998_v34  ;;  %1263 = vmatpush.bf16.msrb.mxu3 %v3282_v41  ;;  %v3206_v34 = vor.u32 %v4137_v23, %v3203_v24  ;;  %v3315_v41 = vld [vmem:[%s6379_s3 + $0x378] sm:$0xf0]  ;;  %v3190_v46 = vor.u32 %v4133_v36, %v3187_v37  ;;  %v3142_v23 = vor.u32 %v4121_v16, %v3139_v17  ;;  %v3445_v24 = vld [vmem:[%s6382_s5 + $0x78] sm:$0xf]  ;;  %v3409_v36 = vld [vmem:[%s6382_s5 + $0x30] sm:$0xf] }
  0xd2   :  { %1285 = vmatpush.bf16.msra.mxu1 %v3126_v35  ;;  %v3334_v35 = vor.u32 %v4169_v28, %v3331_v29  ;;  %v3318_v47 = vor.u32 %v4165_v40, %v3315_v41  ;;  %v3541_v28 = vld [vmem:[%s6382_s5 + $0x138] sm:$0xf]  ;;  %v4224_v29 = vld [vmem:[%s6382_s5 + $0x140] sm:$0xf0]  ;;  %v3385_v40 = vld [vmem:[%s6382_s5] sm:$0xf] }
  0xd3   :  { %1237 = vmatmul.bf16.vlgmr.msrb.gmra.mxu1 %v5022_v62  ;;  %v3542_v32 = vor.u32 %v4224_v29, %v3541_v28  ;;  %v3397_v37 = vld [vmem:[%s6382_s5 + $0x18] sm:$0xf]  ;;  %v4185_v41 = vld [vmem:[%s6382_s5 + $0x8] sm:$0xf0]  ;;  %v3625_v16 = vld [vmem:[%s6382_s5 + $0x1e0] sm:$0xf] }
  0xd4   :  { %1250 = vmatpush.bf16.msrb.mxu2 %v3138_v53  ;;  %v3299_v53 = vld [vmem:[%s6379_s3 + $0x358] sm:$0xf0]  ;;  %v3386_v43 = vor.u32 %v4185_v41, %v3385_v40  ;;  %v4205_v45 = vld [vmem:[%s6382_s5 + $0xac] sm:$0xf]  ;;  %v3613_v28 = vld [vmem:[%s6382_s5 + $0x1c8] sm:$0xf] }
  0xd5   :  { %1272 = vmatpush.bf16.msra.mxu0 %v2982_v48  ;;  %1264 = vmatpush.bf16.msrb.mxu3 %v3266_v58  ;;  %v4129_v48 = vld [vmem:[%s6379_s3 + $0x24c] sm:$0xf]  ;;  %v3011_v58 = vld [vmem:[%s6379_s3 + $0x118] sm:$0xf0]  ;;  %v4242_v29 = vld [vmem:[%s6382_s5 + $0x1d0] sm:$0xf0] }
  0xd6   :  { %1286 = vmatpush.bf16.msra.mxu1 %v3110_v49  ;;  %v3171_v49 = vld [vmem:[%s6379_s3 + $0x258] sm:$0xf0]  ;;  %v3014_v5 = vor.u32 %v4089_v56, %v3011_v58  ;;  %v3462_v58 = vor.u32 %v4202_v54, %v3459_v55  ;;  %v3543_v40 = vld [vmem:[%s6382_s5 + $0x144] sm:$0xf0] }
  0xd7   :  { %1251 = vmatmul.bf16.vlgmr.msrb.gmra.mxu2 %v5056_v21  ;;  %v3757_v54 = vld [vmem:[%s6382_s5 + $0x2e8] sm:$0xf] }
  0xd8   :  { %1299 = vmatpush.bf16.msra.mxu2 %v3254_v59  ;;  %1265 = vmatmul.bf16.vlgmr.msrb.gmra.mxu3 %v5067_v27  ;;  %v3469_v59 = vld [vmem:[%s6382_s5 + $0xa8] sm:$0xf] }
  0xd9   :  { %1313 = vmatpush.bf16.msra.mxu3 %v3382_v60  ;;  %1273 = vmatpush.bf16.msra.mxu0 %v2966_v0  ;;  %v3174_v60 = vor.u32 %v4129_v48, %v3171_v49  ;;  %v4230_v0 = vld [vmem:[%s6382_s5 + $0x170] sm:$0xf0]  ;;  %v3517_v49 = vld [vmem:[%s6382_s5 + $0x108] sm:$0xf] }
  0xda   :  { %1287 = vmatpush.bf16.msra.mxu1 %v3094_v1  ;;  %v3302_v1 = vor.u32 %v4161_v50, %v3299_v53  ;;  %v3566_v10 = vor.u32 %v4230_v0, %v3565_v63  ;;  %v4218_v50 = vld [vmem:[%s6382_s5 + $0x110] sm:$0xf0]  ;;  %v4251_v0 = vld [vmem:[%s6382_s5 + $0x218] sm:$0xf0] }
  0xdb   :  { %v4254_v53 = vld [vmem:[%s6382_s5 + $0x230] sm:$0xf0] }
  0xdc   :  { %1300 = vmatpush.bf16.msra.mxu2 %v3238_v8  ;;  %v3470_v8 = vor.u32 %v4206_v61, %v3469_v59  ;;  %v3505_v59 = vld [vmem:[%s6382_s5 + $0xf0] sm:$0xf] }
  0xdd   :  { %1314 = vmatpush.bf16.msra.mxu3 %v3366_v9  ;;  %1274 = vmatpush.bf16.msra.mxu0 %v2950_v12  ;;  %v3457_v9 = vld [vmem:[%s6382_s5 + $0x90] sm:$0xf]  ;;  %v4203_v12 = vld [vmem:[%s6382_s5 + $0x98] sm:$0xf0] }
  0xde   :  { %1288 = vmatpush.bf16.msra.mxu1 %v3078_v13  ;;  %v3553_v13 = vld [vmem:[%s6382_s5 + $0x150] sm:$0xf] }
  0xdf   :  { %v3649_v61 = vld [vmem:[%s6382_s5 + $0x210] sm:$0xf] }
  0xe0   :  { %1301 = vmatpush.bf16.msra.mxu2 %v3222_v20  ;;  %v3458_v20 = vor.u32 %v4203_v12, %v3457_v9  ;;  %v3650_v3 = vor.u32 %v4251_v0, %v3649_v61  ;;  %v4248_v9 = vld [vmem:[%s6382_s5 + $0x200] sm:$0xf0]  ;;  %v4253_v0 = vld [vmem:[%s6382_s5 + $0x22c] sm:$0xf] }
  0xe1   :  { %1315 = vmatpush.bf16.msra.mxu3 %v3350_v22  ;;  %1275 = vmatpush.bf16.msra.mxu0 %v2934_v25  ;;  %v3554_v22 = vor.u32 %v4227_v14, %v3553_v13  ;;  %v4200_v25 = vld [vmem:[%s6382_s5 + $0x80] sm:$0xf0]  ;;  %v3638_v12 = vor.u32 %v4248_v9, %v3637_v7  ;;  %v3481_v14 = vld [vmem:[%s6382_s5 + $0xc0] sm:$0xf]  ;;  %v4214_v7 = vld [vmem:[%s6382_s5 + $0xf4] sm:$0xf] }
  0xe2   :  { %1289 = vmatpush.bf16.msra.mxu1 %v3062_v26  ;;  %v3270_v26 = vor.u32 %v4153_v18, %v3267_v19  ;;  %v3446_v30 = vor.u32 %v4200_v25, %v3445_v24  ;;  %v4245_v18 = vld [vmem:[%s6382_s5 + $0x1e8] sm:$0xf0]  ;;  %v3567_v25 = vld [vmem:[%s6382_s5 + $0x174] sm:$0xf0]  ;;  %v4250_v9 = vld [vmem:[%s6382_s5 + $0x214] sm:$0xf] }
  0xe3   :  { %v4193_v19 = vld [vmem:[%s6382_s5 + $0x4c] sm:$0xf] }
  0xe4   :  { %1302 = vmatpush.bf16.msra.mxu2 %v3206_v34  ;;  %v4194_v34 = vld [vmem:[%s6382_s5 + $0x50] sm:$0xf0]  ;;  %v4229_v24 = vld [vmem:[%s6382_s5 + $0x16c] sm:$0xf] }
  0xe5   :  { %1316 = vmatpush.bf16.msra.mxu3 %v3334_v35  ;;  %1276 = vmatpush.bf16.msra.mxu0 %v2918_v38  ;;  %v4188_v38 = vld [vmem:[%s6382_s5 + $0x20] sm:$0xf0] }
  0xe6   :  { %1290 = vmatpush.bf16.msra.mxu1 %v3046_v39  ;;  %v3398_v39 = vor.u32 %v4188_v38, %v3397_v37  ;;  %v3399_v37 = vld [vmem:[%s6382_s5 + $0x24] sm:$0xf0]  ;;  %v4223_v38 = vld [vmem:[%s6382_s5 + $0x13c] sm:$0xf] }
  0xe7   :  { %v3546_v41 = vor.u32 %v4223_v38, %v3543_v40  ;;  %v3709_v38 = vld [vmem:[%s6382_s5 + $0x288] sm:$0xf] }
  0xe8   :  { %1303 = vmatpush.bf16.msra.mxu2 %v3190_v46  ;;  %v3471_v46 = vld [vmem:[%s6382_s5 + $0xb4] sm:$0xf0] }
  0xe9   :  { %1317 = vmatpush.bf16.msra.mxu3 %v3318_v47  ;;  %1277 = vmatpush.bf16.msra.mxu0 %v2902_v51  ;;  %v3530_v47 = vor.u32 %v4221_v44, %v3529_v42  ;;  %v3474_v48 = vor.u32 %v4205_v45, %v3471_v46  ;;  %v3661_v51 = vld [vmem:[%s6382_s5 + $0x228] sm:$0xf]  ;;  %v3589_v42 = vld [vmem:[%s6382_s5 + $0x198] sm:$0xf]  ;;  %v4184_v45 = vld [vmem:[%s6382_s5 + $0x4] sm:$0xf] }
  0xea   :  { %1291 = vmatpush.bf16.msra.mxu1 %v3030_v52  ;;  %v3518_v52 = vor.u32 %v4218_v50, %v3517_v49  ;;  %v3662_v56 = vor.u32 %v4254_v53, %v3661_v51  ;;  %v3387_v46 = vld [vmem:[%s6382_s5 + $0xc] sm:$0xf0]  ;;  %v4233_v53 = vld [vmem:[%s6382_s5 + $0x188] sm:$0xf0] }
  0xeb   :  { %v3531_v49 = vld [vmem:[%s6382_s5 + $0x12c] sm:$0xf0] }
  0xec   :  { %1304 = vmatpush.bf16.msra.mxu2 %v3174_v60  ;;  %v4215_v60 = vld [vmem:[%s6382_s5 + $0xf8] sm:$0xf0] }
  0xed   :  { %1318 = vmatpush.bf16.msra.mxu3 %v3302_v1  ;;  %1278 = vmatpush.bf16.msra.mxu0 %v2886_v4  ;;  %v3506_v63 = vor.u32 %v4215_v60, %v3505_v59  ;;  %v4199_v1 = vld [vmem:[%s6382_s5 + $0x7c] sm:$0xf]  ;;  %v3519_v59 = vld [vmem:[%s6382_s5 + $0x114] sm:$0xf0] }
  0xee   :  { %1292 = vmatpush.bf16.msra.mxu1 %v3014_v5  ;;  %v3450_v4 = vor.u32 %v4199_v1, %v3447_v2  ;;  %v3493_v5 = vld [vmem:[%s6382_s5 + $0xd8] sm:$0xf] }
  0xef   :  { %v3663_v1 = vld [vmem:[%s6382_s5 + $0x234] sm:$0xf0] }
  0xf0   :  { %1305 = vmatpush.bf16.msra.mxu2 %v3158_v11  ;;  %1279 = vmatmul.bf16.vlgmr.msra.gmra.mxu0 %v5014_v57  ;;  %v4197_v57 = vld [vmem:[%s6382_s5 + $0x68] sm:$0xf0]  ;;  %v3435_v11 = vld [vmem:[%s6382_s5 + $0x6c] sm:$0xf0]  ;;  %v3666_v2 = vor.u32 %v4253_v0, %v3663_v1  ;;  %v4260_v0 = vld [vmem:[%s6382_s5 + $0x260] sm:$0xf0] }
  0xf1   :  { %1987 = vmatpush.bf16.msrb.mxu0 %v3470_v8  ;;  %1319 = vmatpush.bf16.msra.mxu3 %v3286_v15  ;;  %v3434_v33 = vor.u32 %v4197_v57, %v3433_v31  ;;  %v3494_v8 = vor.u32 %v4212_v6, %v3493_v5  ;;  %v4209_v15 = vld [vmem:[%s6382_s5 + $0xc8] sm:$0xf0]  ;;  %v4190_v31 = vld [vmem:[%s6382_s5 + $0x34] sm:$0xf]  ;;  %v3411_v57 = vld [vmem:[%s6382_s5 + $0x3c] sm:$0xf0] }
  0xf2   :  { %2001 = vmatpush.bf16.msrb.mxu1 %v3566_v10  ;;  %v4196_v10 = vld [vmem:[%s6382_s5 + $0x64] sm:$0xf]  ;;  %v3482_v17 = vor.u32 %v4209_v15, %v3481_v14  ;;  %v4275_v5 = vld [vmem:[%s6382_s5 + $0x2d8] sm:$0xf0]  ;;  %v3733_v15 = vld [vmem:[%s6382_s5 + $0x2b8] sm:$0xf] }
  0xf3   :  { %1293 = vmatmul.bf16.vlgmr.msra.gmra.mxu1 %v5022_v62  ;;  %v3421_v62 = vld [vmem:[%s6382_s5 + $0x48] sm:$0xf]  ;;  %v3438_v13 = vor.u32 %v4196_v10, %v3435_v11  ;;  %v3651_v11 = vld [vmem:[%s6382_s5 + $0x21c] sm:$0xf0] }
  0xf4   :  { %1306 = vmatpush.bf16.msra.mxu2 %v3142_v23  ;;  %v3422_v35 = vor.u32 %v4194_v34, %v3421_v62  ;;  %v3555_v62 = vld [vmem:[%s6382_s5 + $0x15c] sm:$0xf0] }
  0xf5   :  { %1988 = vmatpush.bf16.msrb.mxu0 %v3458_v20  ;;  %1320 = vmatpush.bf16.msra.mxu3 %v3270_v26  ;;  %v3423_v20 = vld [vmem:[%s6382_s5 + $0x54] sm:$0xf0]  ;;  %v3570_v26 = vor.u32 %v4229_v24, %v3567_v25 }
  0xf6   :  { %2002 = vmatpush.bf16.msrb.mxu1 %v3554_v22  ;;  %v3626_v22 = vor.u32 %v4245_v18, %v3625_v16  ;;  %v3426_v23 = vor.u32 %v4193_v19, %v3423_v20  ;;  %v4272_v16 = vld [vmem:[%s6382_s5 + $0x2c0] sm:$0xf0]  ;;  %v4211_v18 = vld [vmem:[%s6382_s5 + $0xdc] sm:$0xf]  ;;  %v3495_v19 = vld [vmem:[%s6382_s5 + $0xe4] sm:$0xf0] }
  0xf7   :  { %1307 = vmatmul.bf16.vlgmr.msra.gmra.mxu2 %v5056_v21  ;;  %v4191_v21 = vld [vmem:[%s6382_s5 + $0x38] sm:$0xf0] }
  0xf8   :  { %1321 = vmatmul.bf16.vlgmr.msra.gmra.mxu3 %v5067_v27  ;;  %v3410_v27 = vor.u32 %v4191_v21, %v3409_v36  ;;  %2015 = vmatpush.bf16.msrb.mxu2 %v3662_v56  ;;  %v4239_v36 = vld [vmem:[%s6382_s5 + $0x1b8] sm:$0xf0]  ;;  %v4278_v56 = vld [vmem:[%s6382_s5 + $0x2f0] sm:$0xf0] }
  0xf9   :  { %1989 = vmatpush.bf16.msrb.mxu0 %v3446_v30  ;;  %v3614_v30 = vor.u32 %v4242_v29, %v3613_v28  ;;  %v3758_v61 = vor.u32 %v4278_v56, %v3757_v54  ;;  %v4247_v20 = vld [vmem:[%s6382_s5 + $0x1fc] sm:$0xf]  ;;  %v3721_v28 = vld [vmem:[%s6382_s5 + $0x2a0] sm:$0xf]  ;;  %v4269_v29 = vld [vmem:[%s6382_s5 + $0x2a8] sm:$0xf0] }
  0xfa   :  { %2003 = vmatpush.bf16.msrb.mxu1 %v3542_v32  ;;  %v4226_v32 = vld [vmem:[%s6382_s5 + $0x154] sm:$0xf] }
  0xfb   :  { %v3558_v34 = vor.u32 %v4226_v32, %v3555_v62  ;;  %2029 = vmatpush.bf16.msrb.mxu3 %v3758_v61  ;;  %v3483_v32 = vld [vmem:[%s6382_s5 + $0xcc] sm:$0xf0]  ;;  %v4207_v61 = vld [vmem:[%s6382_s5 + $0xb8] sm:$0xf0] }
  0xfc   :  { %2016 = vmatpush.bf16.msrb.mxu2 %v3650_v3  ;;  %v5647_v3 = vld [vmem:[%s6383_s4] sm:$0xf] }
  0xfd   :  { %1990 = vmatpush.bf16.msrb.mxu0 %v3434_v33  ;;  %v3414_v33 = vor.u32 %v4190_v31, %v3411_v57  ;;  %v3722_v31 = vor.u32 %v4269_v29, %v3721_v28  ;;  %v4208_v57 = vld [vmem:[%s6382_s5 + $0xc4] sm:$0xf] }
  0xfe   :  { %2004 = vmatpush.bf16.msrb.mxu1 %v3530_v47  ;;  %v4220_v47 = vld [vmem:[%s6382_s5 + $0x124] sm:$0xf] }
  0xff   :  { %v3534_v50 = vor.u32 %v4220_v47, %v3531_v49  ;;  %v4263_v47 = vld [vmem:[%s6382_s5 + $0x278] sm:$0xf0] }
 0x100   :  { %2017 = vmatpush.bf16.msrb.mxu2 %v3638_v12  ;;  %v3654_v12 = vor.u32 %v4250_v9, %v3651_v11 }
 0x101   :  { %1991 = vmatpush.bf16.msrb.mxu0 %v3422_v35  ;;  %v3601_v35 = vld [vmem:[%s6382_s5 + $0x1b0] sm:$0xf] }
 0x102   :  { %2005 = vmatpush.bf16.msrb.mxu1 %v3518_v52  ;;  %v3602_v21 = vor.u32 %v4239_v36, %v3601_v35  ;;  %v3577_v52 = vld [vmem:[%s6382_s5 + $0x180] sm:$0xf]  ;;  %v3627_v35 = vld [vmem:[%s6382_s5 + $0x1ec] sm:$0xf0] }
 0x103   :  { %v3578_v55 = vor.u32 %v4233_v53, %v3577_v52 }
 0x104   :  { %2018 = vmatpush.bf16.msrb.mxu2 %v3626_v22  ;;  %v3498_v22 = vor.u32 %v4211_v18, %v3495_v19  ;;  %v4232_v18 = vld [vmem:[%s6382_s5 + $0x184] sm:$0xf]  ;;  %v3579_v19 = vld [vmem:[%s6382_s5 + $0x18c] sm:$0xf0] }
 0x105   :  { %1992 = vmatpush.bf16.msrb.mxu0 %v3410_v27  ;;  %v4187_v27 = vld [vmem:[%s6382_s5 + $0x1c] sm:$0xf] }
 0x106   :  { %2006 = vmatpush.bf16.msrb.mxu1 %v3506_v63 }
 0x108   :  { %2019 = vmatpush.bf16.msrb.mxu2 %v3614_v30 }
 0x109   :  { %1993 = vmatpush.bf16.msrb.mxu0 %v3398_v39  ;;  %v3402_v39 = vor.u32 %v4187_v27, %v3399_v37 }
 0x10a   :  { %2007 = vmatpush.bf16.msrb.mxu1 %v3494_v8  ;;  %v3507_v8 = vld [vmem:[%s6382_s5 + $0xfc] sm:$0xf0] }
 0x10b   :  { %v3510_v10 = vor.u32 %v4214_v7, %v3507_v8 }
 0x10c   :  { %2020 = vmatpush.bf16.msrb.mxu2 %v3602_v21 }
 0x10d   :  { %1994 = vmatpush.bf16.msrb.mxu0 %v3386_v43  ;;  %v4236_v43 = vld [vmem:[%s6382_s5 + $0x1a0] sm:$0xf0] }
 0x10e   :  { %2008 = vmatpush.bf16.msrb.mxu1 %v3482_v17  ;;  %v3590_v44 = vor.u32 %v4236_v43, %v3589_v42  ;;  %v3734_v17 = vor.u32 %v4272_v16, %v3733_v15  ;;  %v3615_v42 = vld [vmem:[%s6382_s5 + $0x1d4] sm:$0xf0]  ;;  %v4257_v15 = vld [vmem:[%s6382_s5 + $0x248] sm:$0xf0] }
 0x110   :  { %2021 = vmatpush.bf16.msrb.mxu2 %v3590_v44 }
 0x111   :  { %2043 = vmatpush.bf16.msra.mxu0 %v3474_v48  ;;  %v3390_v48 = vor.u32 %v4184_v45, %v3387_v46  ;;  %v3697_v46 = vld [vmem:[%s6382_s5 + $0x270] sm:$0xf] }
 0x112   :  { %2057 = vmatpush.bf16.msra.mxu1 %v3570_v26  ;;  %v3698_v49 = vor.u32 %v4263_v47, %v3697_v46  ;;  %v3429_v46 = vld [vmem:[%s6382_s5 + $0x50] sm:$0xf] }
 0x114   :  { %2022 = vmatpush.bf16.msrb.mxu2 %v3578_v55 }
 0x115   :  { %2044 = vmatpush.bf16.msra.mxu0 %v3462_v58  ;;  %v4217_v58 = vld [vmem:[%s6382_s5 + $0x10c] sm:$0xf] }
 0x116   :  { %2058 = vmatpush.bf16.msra.mxu1 %v3558_v34  ;;  %v3522_v63 = vor.u32 %v4217_v58, %v3519_v59  ;;  %v3486_v34 = vor.u32 %v4208_v57, %v3483_v32  ;;  %v456_v58 = vperm.slane %v5647_v3, 1  ;;  %v3477_v59 = vld [vmem:[%s6382_s5 + $0xb0] sm:$0xf]  ;;  %v4201_v57 = vld [vmem:[%s6382_s5 + $0x88] sm:$0xf0] }
 0x117   :  { %v3478_v9 = vor.u32 %v4207_v61, %v3477_v59  ;;  %v4274_v32 = vld [vmem:[%s6382_s5 + $0x2d4] sm:$0xf]  ;;  %v3417_v61 = vld [vmem:[%s6382_s5 + $0x38] sm:$0xf] }
 0x118   :  { %2071 = vmatpush.bf16.msra.mxu2 %v3666_v2 }
 0x119   :  { %2045 = vmatpush.bf16.msra.mxu0 %v3450_v4  ;;  %v3745_v4 = vld [vmem:[%s6382_s5 + $0x2d0] sm:$0xf] }
 0x11a   :  { %2059 = vmatpush.bf16.msra.mxu1 %v3546_v41  ;;  %v3746_v6 = vor.u32 %v4275_v5, %v3745_v4  ;;  %v4241_v41 = vld [vmem:[%s6382_s5 + $0x1cc] sm:$0xf]  ;;  %v4235_v4 = vld [vmem:[%s6382_s5 + $0x19c] sm:$0xf]  ;;  %v3591_v5 = vld [vmem:[%s6382_s5 + $0x1a4] sm:$0xf0] }
 0x11b   :  { %v3618_v44 = vor.u32 %v4241_v41, %v3615_v42  ;;  %v3594_v8 = vor.u32 %v4235_v4, %v3591_v5 }
 0x11c   :  { %2030 = vmatpush.bf16.msrb.mxu3 %v3746_v6  ;;  %2072 = vmatpush.bf16.msra.mxu2 %v3654_v12 }
 0x11d   :  { %2046 = vmatpush.bf16.msra.mxu0 %v3438_v13  ;;  %v455_v13 = vperm.slane %v5647_v3, 0 }
 0x11e   :  { %2060 = vmatpush.bf16.msra.mxu1 %v3534_v50  ;;  %v4238_v50 = vld [vmem:[%s6382_s5 + $0x1b4] sm:$0xf] }
 0x120   :  { %2031 = vmatpush.bf16.msrb.mxu3 %v3734_v17 }
 0x121   :  { %2047 = vmatpush.bf16.msra.mxu0 %v3426_v23  ;;  %v3639_v23 = vld [vmem:[%s6382_s5 + $0x204] sm:$0xf0] }
 0x122   :  { %2061 = vmatpush.bf16.msra.mxu1 %v3522_v63  ;;  %v3642_v24 = vor.u32 %v4247_v20, %v3639_v23  ;;  %v3685_v63 = vld [vmem:[%s6382_s5 + $0x258] sm:$0xf]  ;;  %v4277_v23 = vld [vmem:[%s6382_s5 + $0x2ec] sm:$0xf] }
 0x123   :  { %v3686_v2 = vor.u32 %v4260_v0, %v3685_v63  ;;  %v4192_v0 = vld [vmem:[%s6382_s5 + $0x40] sm:$0xf0] }
 0x124   :  { %2073 = vmatpush.bf16.msra.mxu2 %v3642_v24  ;;  %2032 = vmatpush.bf16.msrb.mxu3 %v3722_v31  ;;  %v3759_v24 = vld [vmem:[%s6382_s5 + $0x2f4] sm:$0xf0]  ;;  %v3453_v31 = vld [vmem:[%s6382_s5 + $0x80] sm:$0xf] }
 0x125   :  { %2048 = vmatpush.bf16.msra.mxu0 %v3414_v33  ;;  %v4244_v33 = vld [vmem:[%s6382_s5 + $0x1e4] sm:$0xf] }
 0x126   :  { %2062 = vmatpush.bf16.msra.mxu1 %v3510_v10  ;;  %v3630_v36 = vor.u32 %v4244_v33, %v3627_v35  ;;  %v3465_v10 = vld [vmem:[%s6382_s5 + $0x98] sm:$0xf]  ;;  %v3747_v33 = vld [vmem:[%s6382_s5 + $0x2dc] sm:$0xf0] }
 0x128   :  { %2074 = vmatpush.bf16.msra.mxu2 %v3630_v36  ;;  %v3454_v36 = vor.u32 %v4201_v57, %v3453_v31  ;;  %v3537_v31 = vld [vmem:[%s6382_s5 + $0x128] sm:$0xf]  ;;  %v4222_v57 = vld [vmem:[%s6382_s5 + $0x130] sm:$0xf0] }
 0x129   :  { %2049 = vmatpush.bf16.msra.mxu0 %v3402_v39  ;;  %v4266_v39 = vld [vmem:[%s6382_s5 + $0x290] sm:$0xf0] }
 0x12a   :  { %2063 = vmatpush.bf16.msra.mxu1 %v3498_v22  ;;  %v3710_v40 = vor.u32 %v4266_v39, %v3709_v38  ;;  %v3582_v22 = vor.u32 %v4232_v18, %v3579_v19  ;;  %v4271_v39 = vld [vmem:[%s6382_s5 + $0x2bc] sm:$0xf] }
 0x12c   :  { %v1112_v51 = vpop.f32.mrf.mxu0  ;;  %2033 = vmatpush.bf16.msrb.mxu3 %v3710_v40  ;;  %2075 = vmatpush.bf16.msra.mxu2 %v3618_v44  ;;  %v3735_v40 = vld [vmem:[%s6382_s5 + $0x2c4] sm:$0xf0] }
 0x12d   :  { %2050 = vmatpush.bf16.msra.mxu0 %v3390_v48  ;;  %v1126_v60 = vpop.f32.mrf.mxu1  ;;  %v1113_v25 = vadd.f32 %v1112_v51, %v455_v13  ;;  %v3603_v51 = vld [vmem:[%s6382_s5 + $0x1bc] sm:$0xf0]  ;;  %v3738_v44 = vor.u32 %v4271_v39, %v3735_v40  ;;  %v3525_v39 = vld [vmem:[%s6382_s5 + $0x110] sm:$0xf]  ;;  %v4219_v40 = vld [vmem:[%s6382_s5 + $0x118] sm:$0xf0] }
 0x12e   :  { %2064 = vmatpush.bf16.msra.mxu1 %v3486_v34  ;;  %v3606_v56 = vor.u32 %v4238_v50, %v3603_v51  ;;  %v3750_v34 = vor.u32 %v4274_v32, %v3747_v33  ;;  %v4231_v50 = vld [vmem:[%s6382_s5 + $0x178] sm:$0xf0]  ;;  %v457_v51 = vperm.slane %v5647_v3, 2 }
 0x12f   :  { %v1127_v21 = vadd.f32 %v1126_v60, %v1113_v25  ;;  %v4259_v33 = vld [vmem:[%s6382_s5 + $0x25c] sm:$0xf] }
 0x130   :  { %2034 = vmatpush.bf16.msrb.mxu3 %v3698_v49  ;;  %2076 = vmatpush.bf16.msra.mxu2 %v3606_v56  ;;  %v3573_v49 = vld [vmem:[%s6382_s5 + $0x170] sm:$0xf] }
 0x134   :  { %v1114_v14 = vpop.f32.mrf.mxu0  ;;  %2035 = vmatpush.bf16.msrb.mxu3 %v3686_v2  ;;  %2077 = vmatpush.bf16.msra.mxu2 %v3594_v8  ;;  %v4228_v2 = vld [vmem:[%s6382_s5 + $0x160] sm:$0xf0] }
 0x135   :  { %v1128_v26 = vpop.f32.mrf.mxu1  ;;  %v1115_v27 = vadd.f32 %v1114_v14, %v455_v13  ;;  %v4204_v13 = vld [vmem:[%s6382_s5 + $0xa0] sm:$0xf0]  ;;  %v3673_v14 = vld [vmem:[%s6382_s5 + $0x240] sm:$0xf] }
 0x136   :  { %v3674_v17 = vor.u32 %v4257_v15, %v3673_v14  ;;  %v3466_v25 = vor.u32 %v4204_v13, %v3465_v10  ;;  %v3405_v14 = vld [vmem:[%s6382_s5 + $0x20] sm:$0xf]  ;;  %v4189_v15 = vld [vmem:[%s6382_s5 + $0x28] sm:$0xf0] }
 0x137   :  { %v1129_v45 = vadd.f32 %v1128_v26, %v1115_v27  ;;  %v3762_v26 = vor.u32 %v4277_v23, %v3759_v24  ;;  %v3441_v27 = vld [vmem:[%s6382_s5 + $0x68] sm:$0xf] }
 0x138   :  { %2036 = vmatpush.bf16.msrb.mxu3 %v3674_v17  ;;  %2078 = vmatpush.bf16.msra.mxu2 %v3582_v22  ;;  %v4225_v17 = vld [vmem:[%s6382_s5 + $0x148] sm:$0xf0]  ;;  %v3699_v22 = vld [vmem:[%s6382_s5 + $0x27c] sm:$0xf0] }
 0x13a   :  { %v1140_v30 = vpop.f32.mrf.mxu2 }
 0x13b   :  { %v1154_v62 = vpop.f32.mrf.mxu3  ;;  %v1141_v43 = vadd.f32 %v1140_v30, %v1127_v21 }
 0x13c   :  { %v1168_v37 = vpop.f32.mrf.mxu0  ;;  %2085 = vmatpush.bf16.msra.mxu3 %v3762_v26 }
 0x13d   :  { %v1155_v52 = vadd.f32 %v1154_v62, %v1141_v43  ;;  %v1182_v53 = vpop.f32.mrf.mxu1  ;;  %v1169_v11 = vadd.f32 %v1168_v37, %v456_v58  ;;  %v4198_v37 = vld [vmem:[%s6382_s5 + $0x70] sm:$0xf0] }
 0x13f   :  { %v1327_v6 = vmax.f32 %v1155_v52, 0.0  ;;  %v1183_v28 = vadd.f32 %v1182_v53, %v1169_v11  ;;  %v4268_v52 = vld [vmem:[%s6382_s5 + $0x2a4] sm:$0xf]  ;;  %v3723_v53 = vld [vmem:[%s6382_s5 + $0x2ac] sm:$0xf0]  ;;  %v3418_v11 = vor.u32 %v4192_v0, %v3417_v61 }
 0x140   :  { %2086 = vmatpush.bf16.msra.mxu3 %v3750_v34  ;;  %v4213_v61 = vld [vmem:[%s6382_s5 + $0xe8] sm:$0xf0]  ;;  %v3645_v0 = vld [vmem:[%s6382_s5 + $0x200] sm:$0xf] }
 0x142   :  { %v1142_v48 = vpop.f32.mrf.mxu2 }
 0x143   :  { %v1143_v54 = vadd.f32 %v1142_v48, %v1129_v45  ;;  %v1156_v55 = vpop.f32.mrf.mxu3  ;;  %v3442_v45 = vor.u32 %v4198_v37, %v3441_v27  ;;  %v4195_v48 = vld [vmem:[%s6382_s5 + $0x58] sm:$0xf0]  ;;  %v3538_v37 = vor.u32 %v4222_v57, %v3537_v31 }
 0x144   :  { %v1170_v1 = vpop.f32.mrf.mxu0  ;;  %2087 = vmatpush.bf16.msra.mxu3 %v3738_v44  ;;  %v3430_v59 = vor.u32 %v4195_v48, %v3429_v46  ;;  %v4256_v44 = vld [vmem:[%s6382_s5 + $0x244] sm:$0xf] }
 0x145   :  { %v1157_v60 = vadd.f32 %v1156_v55, %v1143_v54  ;;  %v1171_v29 = vadd.f32 %v1170_v1, %v456_v58  ;;  %v1184_v30 = vpop.f32.mrf.mxu1  ;;  %v3726_v58 = vor.u32 %v4268_v52, %v3723_v53  ;;  %v3561_v1 = vld [vmem:[%s6382_s5 + $0x158] sm:$0xf]  ;;  %v4216_v52 = vld [vmem:[%s6382_s5 + $0x100] sm:$0xf0] }
 0x146   :  { %v3562_v13 = vor.u32 %v4228_v2, %v3561_v1 }
 0x147   :  { %v1331_v7 = vmax.f32 %v1157_v60, 0.0  ;;  %v1185_v21 = vadd.f32 %v1184_v30, %v1171_v29  ;;  %v3574_v60 = vor.u32 %v4231_v50, %v3573_v49  ;;  %v4186_v29 = vld [vmem:[%s6382_s5 + $0x10] sm:$0xf0]  ;;  %v3526_v49 = vor.u32 %v4219_v40, %v3525_v39 }
 0x148   :  { %2088 = vmatpush.bf16.msra.mxu3 %v3726_v58 }
 0x149   :  { %v5750_v12 = vpack.c.bf16 %v1331_v7, %v1327_v6  ;;  %v4265_v6 = vld [vmem:[%s6382_s5 + $0x28c] sm:$0xf]  ;;  %v3711_v7 = vld [vmem:[%s6382_s5 + $0x294] sm:$0xf0] }
 0x14a   :  { %v1196_v16 = vpop.f32.mrf.mxu2  ;;  %v3714_v10 = vor.u32 %v4265_v6, %v3711_v7  ;;  %v458_v6 = vperm.slane %v5647_v3, 3  ;;  %v3633_v7 = vld [vmem:[%s6382_s5 + $0x1e8] sm:$0xf]  ;;  %v4243_v3 = vld [vmem:[%s6382_s5 + $0x1d8] sm:$0xf0] }
 0x14b   :  { %v1210_v20 = vpop.f32.mrf.mxu3  ;;  %1995 = vmatmul.bf16.vlgmr.msrb.gmra.mxu0 %v5750_v12  ;;  %v1197_v62 = vadd.f32 %v1196_v16, %v1183_v28  ;;  %v3549_v16 = vld [vmem:[%s6382_s5 + $0x140] sm:$0xf]  ;;  %v3393_v28 = vld [vmem:[%s6382_s5 + $0x8] sm:$0xf] }
 0x14c   :  { %2099 = vmatpush.bf16.msrb.mxu0 %v3478_v9  ;;  %2089 = vmatpush.bf16.msra.mxu3 %v3714_v10  ;;  %v3550_v26 = vor.u32 %v4225_v17, %v3549_v16 }
 0x14d   :  { %v1224_v35 = vpop.f32.mrf.mxu0  ;;  %v1211_v41 = vadd.f32 %v1210_v20, %v1197_v62  ;;  %v4262_v20 = vld [vmem:[%s6382_s5 + $0x274] sm:$0xf]  ;;  %v3687_v62 = vld [vmem:[%s6382_s5 + $0x264] sm:$0xf0] }
 0x14e   :  { %v1225_v4 = vadd.f32 %v1224_v35, %v457_v51  ;;  %v3702_v23 = vor.u32 %v4262_v20, %v3699_v22  ;;  %v3394_v35 = vor.u32 %v4186_v29, %v3393_v28  ;;  %v3609_v22 = vld [vmem:[%s6382_s5 + $0x1b8] sm:$0xf]  ;;  %v3597_v29 = vld [vmem:[%s6382_s5 + $0x1a0] sm:$0xf] }
 0x14f   :  { %v1328_v54 = vmax.f32 %v1211_v41, 0.0  ;;  %v3669_v41 = vld [vmem:[%s6382_s5 + $0x230] sm:$0xf] }
 0x150   :  { %2100 = vmatpush.bf16.msrb.mxu0 %v3466_v25  ;;  %v1238_v55 = vpop.f32.mrf.mxu1  ;;  %v3406_v25 = vor.u32 %v4189_v15, %v3405_v14  ;;  %2090 = vmatpush.bf16.msra.mxu3 %v3702_v23  ;;  %v3621_v14 = vld [vmem:[%s6382_s5 + $0x1d0] sm:$0xf]  ;;  %v4240_v23 = vld [vmem:[%s6382_s5 + $0x1c0] sm:$0xf0] }
 0x151   :  { %v1239_v18 = vadd.f32 %v1238_v55, %v1225_v4  ;;  %v4252_v55 = vld [vmem:[%s6382_s5 + $0x220] sm:$0xf0]  ;;  %v3489_v4 = vld [vmem:[%s6382_s5 + $0xc8] sm:$0xf] }
 0x152   :  { %v1198_v38 = vpop.f32.mrf.mxu2 }
 0x153   :  { %v1199_v42 = vadd.f32 %v1198_v38, %v1185_v21  ;;  %v1212_v43 = vpop.f32.mrf.mxu3 }
 0x154   :  { %2101 = vmatpush.bf16.msrb.mxu0 %v3454_v36  ;;  %v3690_v36 = vor.u32 %v4259_v33, %v3687_v62  ;;  %v3585_v62 = vld [vmem:[%s6382_s5 + $0x188] sm:$0xf] }
 0x155   :  { %v1213_v47 = vadd.f32 %v1212_v43, %v1199_v42  ;;  %v1226_v5 = vpop.f32.mrf.mxu0  ;;  %v4255_v43 = vld [vmem:[%s6382_s5 + $0x238] sm:$0xf0] }
 0x156   :  { %v1227_v19 = vadd.f32 %v1226_v5, %v457_v51  ;;  %2091 = vmatpush.bf16.msra.mxu3 %v3690_v36  ;;  %v3670_v50 = vor.u32 %v4255_v43, %v3669_v41  ;;  %v3513_v51 = vld [vmem:[%s6382_s5 + $0xf8] sm:$0xf]  ;;  %v4210_v5 = vld [vmem:[%s6382_s5 + $0xd0] sm:$0xf0]  ;;  %v3765_v36 = vld [vmem:[%s6382_s5 + $0x2f0] sm:$0xf] }
 0x157   :  { %v1332_v56 = vmax.f32 %v1213_v47, 0.0  ;;  %v3490_v10 = vor.u32 %v4210_v5, %v3489_v4  ;;  %v3753_v41 = vld [vmem:[%s6382_s5 + $0x2d8] sm:$0xf]  ;;  %v3817_v4 = vld [vmem:[%s6384_s7 + $0x60] sm:$0xf] }
 0x158   :  { %2102 = vmatpush.bf16.msrb.mxu0 %v3442_v45  ;;  %v1240_v30 = vpop.f32.mrf.mxu1  ;;  %v3675_v45 = vld [vmem:[%s6382_s5 + $0x24c] sm:$0xf0]  ;;  %v4293_v5 = vld [vmem:[%s6384_s7 + $0x64] sm:$0xf0] }
 0x159   :  { %v5820_v63 = vpack.c.bf16 %v1332_v56, %v1328_v54  ;;  %v1241_v32 = vadd.f32 %v1240_v30, %v1227_v19  ;;  %v3678_v46 = vor.u32 %v4256_v44, %v3675_v45  ;;  %v3657_v54 = vld [vmem:[%s6382_s5 + $0x218] sm:$0xf]  ;;  %v3514_v56 = vor.u32 %v4216_v52, %v3513_v51  ;;  %v4237_v30 = vld [vmem:[%s6382_s5 + $0x1a8] sm:$0xf0]  ;;  %v3741_v44 = vld [vmem:[%s6382_s5 + $0x2c0] sm:$0xf] }
 0x15a   :  { %v1252_v8 = vpop.f32.mrf.mxu2  ;;  %v4273_v45 = vld [vmem:[%s6382_s5 + $0x2c8] sm:$0xf0]  ;;  %v4267_v51 = vld [vmem:[%s6382_s5 + $0x298] sm:$0xf0] }
 0x15b   :  { %v1266_v9 = vpop.f32.mrf.mxu3  ;;  %2009 = vmatmul.bf16.vlgmr.msrb.gmra.mxu1 %v5820_v63  ;;  %2051 = vmatmul.bf16.vlgmr.msra.gmra.mxu0 %v5750_v12  ;;  %v1253_v24 = vadd.f32 %v1252_v8, %v1239_v18  ;;  %v4246_v8 = vld [vmem:[%s6382_s5 + $0x1f0] sm:$0xf0]  ;;  %v3622_v18 = vor.u32 %v4243_v3, %v3621_v14  ;;  %v3827_v3 = vld [vmem:[%s6384_s7 + $0x78] sm:$0xf0] }
 0x15c   :  { %2103 = vmatpush.bf16.msrb.mxu0 %v3430_v59  ;;  %2113 = vmatpush.bf16.msrb.mxu1 %v3574_v60  ;;  %v3658_v59 = vor.u32 %v4252_v55, %v3657_v54  ;;  %v3501_v60 = vld [vmem:[%s6382_s5 + $0xe0] sm:$0xf]  ;;  %v4264_v54 = vld [vmem:[%s6382_s5 + $0x280] sm:$0xf0]  ;;  %v4294_v14 = vld [vmem:[%s6384_s7 + $0x74] sm:$0xf] }
 0x15d   :  { %v1267_v21 = vadd.f32 %v1266_v9, %v1253_v24  ;;  %2092 = vmatpush.bf16.msra.mxu3 %v3678_v46  ;;  %v3502_v1 = vor.u32 %v4213_v61, %v3501_v60  ;;  %v3742_v46 = vor.u32 %v4273_v45, %v3741_v44  ;;  %v3681_v60 = vld [vmem:[%s6382_s5 + $0x248] sm:$0xf]  ;;  %v4258_v61 = vld [vmem:[%s6382_s5 + $0x250] sm:$0xf0] }
 0x15e   :  { %v4305_v44 = vld [vmem:[%s6384_s7 + $0xc4] sm:$0xf0]  ;;  %v4286_v45 = vld [vmem:[%s6384_s7 + $0x34] sm:$0xf] }
 0x15f   :  { %v1329_v47 = vmax.f32 %v1267_v21, 0.0  ;;  %v4279_v21 = vld [vmem:[%s6382_s5 + $0x2f8] sm:$0xf0] }
 0x160   :  { %2104 = vmatpush.bf16.msrb.mxu0 %v3418_v11  ;;  %2114 = vmatpush.bf16.msrb.mxu1 %v3562_v13  ;;  %v3634_v11 = vor.u32 %v4246_v8, %v3633_v7  ;;  %v3766_v39 = vor.u32 %v4279_v21, %v3765_v36  ;;  %v3809_v7 = vld [vmem:[%s6384_s7 + $0x50] sm:$0xf]  ;;  %v4291_v8 = vld [vmem:[%s6384_s7 + $0x54] sm:$0xf0] }
 0x161   :  { %v4307_v21 = vld [vmem:[%s6384_s7 + $0xd4] sm:$0xf0] }
 0x162   :  { %v1254_v34 = vpop.f32.mrf.mxu2 }
 0x163   :  { %v1255_v27 = vadd.f32 %v1254_v34, %v1241_v32  ;;  %v1268_v38 = vpop.f32.mrf.mxu3 }
 0x164   :  { %2105 = vmatpush.bf16.msrb.mxu0 %v3406_v25  ;;  %2115 = vmatpush.bf16.msrb.mxu1 %v3550_v26  ;;  %v3610_v26 = vor.u32 %v4240_v23, %v3609_v22  ;;  %v4292_v23 = vld [vmem:[%s6384_s7 + $0x64] sm:$0xf] }
 0x165   :  { %v1269_v42 = vadd.f32 %v1268_v38, %v1255_v27 }
 0x167   :  { %v1333_v48 = vmax.f32 %v1269_v42, 0.0  ;;  %v4276_v42 = vld [vmem:[%s6382_s5 + $0x2e0] sm:$0xf0] }
 0x168   :  { %2106 = vmatpush.bf16.msrb.mxu0 %v3394_v35  ;;  %2116 = vmatpush.bf16.msrb.mxu1 %v3538_v37  ;;  %v4234_v35 = vld [vmem:[%s6382_s5 + $0x190] sm:$0xf0]  ;;  %v3754_v43 = vor.u32 %v4276_v42, %v3753_v41  ;;  %v4281_v41 = vld [vmem:[%s6384_s7 + $0x4] sm:$0xf0]  ;;  %v3865_v42 = vld [vmem:[%s6384_s7 + $0xc0] sm:$0xf] }
 0x169   :  { %v5899_v53 = vpack.c.bf16 %v1333_v48, %v1329_v47  ;;  %v3586_v38 = vor.u32 %v4234_v35, %v3585_v62  ;;  %v3729_v47 = vld [vmem:[%s6382_s5 + $0x2a8] sm:$0xf]  ;;  %v4270_v48 = vld [vmem:[%s6382_s5 + $0x2b0] sm:$0xf0]  ;;  %v3777_v62 = vld [vmem:[%s6384_s7 + $0x10] sm:$0xf] }
 0x16a   :  { %v3873_v35 = vld [vmem:[%s6384_s7 + $0xd0] sm:$0xf] }
 0x16b   :  { %2065 = vmatmul.bf16.vlgmr.msra.gmra.mxu1 %v5820_v63  ;;  %2107 = vmatmul.bf16.vlgmr.msrb.gmra.mxu0 %v5750_v12  ;;  %v4249_v12 = vld [vmem:[%s6382_s5 + $0x208] sm:$0xf0] }
 0x16c   :  { %2023 = vmatmul.bf16.vlgmr.msrb.gmra.mxu2 %v5899_v53  ;;  %2117 = vmatpush.bf16.msrb.mxu1 %v3526_v49  ;;  %v3646_v2 = vor.u32 %v4249_v12, %v3645_v0  ;;  %v3730_v49 = vor.u32 %v4270_v48, %v3729_v47  ;;  %v3682_v0 = vor.u32 %v4258_v61, %v3681_v60  ;;  %v3825_v12 = vld [vmem:[%s6384_s7 + $0x70] sm:$0xf]  ;;  %v3883_v60 = vld [vmem:[%s6384_s7 + $0xe8] sm:$0xf0] }
 0x16d   :  { %v1280_v58 = vpop.f32.mrf.mxu0  ;;  %2127 = vmatpush.bf16.msrb.mxu2 %v3670_v50  ;;  %v3717_v50 = vld [vmem:[%s6382_s5 + $0x290] sm:$0xf]  ;;  %v3866_v47 = vor.u32 %v4305_v44, %v3865_v42  ;;  %v4322_v44 = vld [vmem:[%s6384_s7 + $0x154] sm:$0xf] }
 0x16e   :  { %v1281_v13 = vadd.f32 %v1280_v58, %v458_v6  ;;  %v3718_v52 = vor.u32 %v4267_v51, %v3717_v50  ;;  %v4261_v58 = vld [vmem:[%s6382_s5 + $0x268] sm:$0xf0]  ;;  %v3891_v50 = vld [vmem:[%s6384_s7 + $0xf8] sm:$0xf0] }
 0x170   :  { %2118 = vmatpush.bf16.msrb.mxu1 %v3514_v56  ;;  %v1294_v9 = vpop.f32.mrf.mxu1  ;;  %v3693_v56 = vld [vmem:[%s6382_s5 + $0x260] sm:$0xf] }
 0x171   :  { %2128 = vmatpush.bf16.msrb.mxu2 %v3658_v59  ;;  %v1295_v19 = vadd.f32 %v1294_v9, %v1281_v13  ;;  %v3694_v59 = vor.u32 %v4261_v58, %v3693_v56  ;;  %v3810_v9 = vor.u32 %v4291_v8, %v3809_v7  ;;  %v3787_v56 = vld [vmem:[%s6384_s7 + $0x28] sm:$0xf0]  ;;  %v4308_v58 = vld [vmem:[%s6384_s7 + $0xe4] sm:$0xf]  ;;  %v3875_v7 = vld [vmem:[%s6384_s7 + $0xd8] sm:$0xf0] }
 0x172   :  { %v3886_v61 = vor.u32 %v4308_v58, %v3883_v60  ;;  %v3931_v58 = vld [vmem:[%s6384_s7 + $0x148] sm:$0xf0] }
 0x174   :  { %2119 = vmatpush.bf16.msrb.mxu1 %v3502_v1  ;;  %v4295_v1 = vld [vmem:[%s6384_s7 + $0x74] sm:$0xf0] }
 0x175   :  { %2129 = vmatpush.bf16.msrb.mxu2 %v3646_v2  ;;  %v1282_v15 = vpop.f32.mrf.mxu0  ;;  %v3826_v2 = vor.u32 %v4295_v1, %v3825_v12  ;;  %v4301_v12 = vld [vmem:[%s6384_s7 + $0xa4] sm:$0xf0] }
 0x176   :  { %v1283_v20 = vadd.f32 %v1282_v15, %v458_v6  ;;  %v3818_v6 = vor.u32 %v4293_v5, %v3817_v4  ;;  %v3793_v15 = vld [vmem:[%s6384_s7 + $0x30] sm:$0xf]  ;;  %v3779_v4 = vld [vmem:[%s6384_s7 + $0x18] sm:$0xf0]  ;;  %v4306_v5 = vld [vmem:[%s6384_s7 + $0xd4] sm:$0xf] }
 0x177   :  { %2458 = vmatpush.bf16.msra.mxu0 %v3826_v2  ;;  %v4282_v2 = vld [vmem:[%s6384_s7 + $0x14] sm:$0xf]  ;;  %v3878_v8 = vor.u32 %v4306_v5, %v3875_v7  ;;  %v3923_v5 = vld [vmem:[%s6384_s7 + $0x138] sm:$0xf0] }
 0x178   :  { %2120 = vmatpush.bf16.msrb.mxu1 %v3490_v10  ;;  %v1296_v25 = vpop.f32.mrf.mxu1  ;;  %v3801_v10 = vld [vmem:[%s6384_s7 + $0x40] sm:$0xf] }
 0x179   :  { %2130 = vmatpush.bf16.msrb.mxu2 %v3634_v11  ;;  %v1297_v28 = vadd.f32 %v1296_v25, %v1283_v20  ;;  %v4289_v11 = vld [vmem:[%s6384_s7 + $0x44] sm:$0xf0] }
 0x17a   :  { %v1308_v16 = vpop.f32.mrf.mxu2  ;;  %v3802_v13 = vor.u32 %v4289_v11, %v3801_v10  ;;  %v4299_v10 = vld [vmem:[%s6384_s7 + $0x94] sm:$0xf0] }
 0x17b   :  { %v1322_v17 = vpop.f32.mrf.mxu3  ;;  %2121 = vmatmul.bf16.vlgmr.msrb.gmra.mxu1 %v5820_v63  ;;  %v1309_v24 = vadd.f32 %v1308_v16, %v1295_v19  ;;  %v3598_v63 = vor.u32 %v4237_v30, %v3597_v29  ;;  %2459 = vmatpush.bf16.msra.mxu0 %v3818_v6  ;;  %v3830_v16 = vor.u32 %v4294_v14, %v3827_v3  ;;  %v4311_v19 = vld [vmem:[%s6384_s7 + $0xf4] sm:$0xf0]  ;;  %v3881_v29 = vld [vmem:[%s6384_s7 + $0xe0] sm:$0xf]  ;;  %v3771_v14 = vld [vmem:[%s6384_s7 + $0x8] sm:$0xf0] }
 0x17c   :  { %2079 = vmatmul.bf16.vlgmr.msra.gmra.mxu2 %v5899_v53  ;;  %v3782_v6 = vor.u32 %v4282_v2, %v3779_v4  ;;  %v4304_v3 = vld [vmem:[%s6384_s7 + $0xc4] sm:$0xf]  ;;  %v4318_v2 = vld [vmem:[%s6384_s7 + $0x134] sm:$0xf] }
 0x17d   :  { %2131 = vmatpush.bf16.msrb.mxu2 %v3622_v18  ;;  %v1323_v57 = vadd.f32 %v1322_v17, %v1309_v24  ;;  %v4287_v17 = vld [vmem:[%s6384_s7 + $0x34] sm:$0xf0]  ;;  %v3889_v18 = vld [vmem:[%s6384_s7 + $0xf0] sm:$0xf]  ;;  %v3819_v24 = vld [vmem:[%s6384_s7 + $0x68] sm:$0xf0]  ;;  %v3926_v7 = vor.u32 %v4318_v2, %v3923_v5 }
 0x17e   :  { %v3794_v20 = vor.u32 %v4287_v17, %v3793_v15  ;;  %v3890_v22 = vor.u32 %v4311_v19, %v3889_v18  ;;  %v3822_v25 = vor.u32 %v4292_v23, %v3819_v24  ;;  %v3833_v18 = vld [vmem:[%s6384_s7 + $0x80] sm:$0xf]  ;;  %v4297_v19 = vld [vmem:[%s6384_s7 + $0x84] sm:$0xf0]  ;;  %v3953_v23 = vld [vmem:[%s6384_s7 + $0x170] sm:$0xf] }
 0x17f   :  { %v1330_v27 = vmax.f32 %v1323_v57, 0.0  ;;  %2460 = vmatpush.bf16.msra.mxu0 %v3810_v9  ;;  %v4290_v57 = vld [vmem:[%s6384_s7 + $0x54] sm:$0xf]  ;;  %v3841_v9 = vld [vmem:[%s6384_s7 + $0x90] sm:$0xf] }
 0x180   :  { %2472 = vmatpush.bf16.msra.mxu1 %v3890_v22  ;;  %v3842_v11 = vor.u32 %v4299_v10, %v3841_v9  ;;  %v3834_v22 = vor.u32 %v4297_v19, %v3833_v18  ;;  %v4327_v24 = vld [vmem:[%s6384_s7 + $0x174] sm:$0xf0]  ;;  %v3913_v10 = vld [vmem:[%s6384_s7 + $0x120] sm:$0xf] }
 0x181   :  { %2132 = vmatpush.bf16.msrb.mxu2 %v3610_v26  ;;  %v3785_v26 = vld [vmem:[%s6384_s7 + $0x20] sm:$0xf] }
 0x182   :  { %v1310_v31 = vpop.f32.mrf.mxu2 }
 0x183   :  { %v1311_v32 = vadd.f32 %v1310_v31, %v1297_v28  ;;  %v1324_v33 = vpop.f32.mrf.mxu3  ;;  %2461 = vmatpush.bf16.msra.mxu0 %v3802_v13  ;;  %v4285_v28 = vld [vmem:[%s6384_s7 + $0x24] sm:$0xf0]  ;;  %v4280_v13 = vld [vmem:[%s6384_s7 + $0x4] sm:$0xf] }
 0x184   :  { %v3786_v30 = vor.u32 %v4285_v28, %v3785_v26  ;;  %v4309_v31 = vld [vmem:[%s6384_s7 + $0xe4] sm:$0xf0]  ;;  %v3774_v15 = vor.u32 %v4280_v13, %v3771_v14  ;;  %v3954_v26 = vor.u32 %v4327_v24, %v3953_v23  ;;  %v3859_v28 = vld [vmem:[%s6384_s7 + $0xb8] sm:$0xf0]  ;;  %v4316_v13 = vld [vmem:[%s6384_s7 + $0x124] sm:$0xf] }
 0x185   :  { %v1325_v34 = vadd.f32 %v1324_v33, %v1311_v32  ;;  %2133 = vmatpush.bf16.msrb.mxu2 %v3598_v63  ;;  %v3811_v32 = vld [vmem:[%s6384_s7 + $0x58] sm:$0xf0]  ;;  %v3882_v33 = vor.u32 %v4309_v31, %v3881_v29  ;;  %v4326_v29 = vld [vmem:[%s6384_s7 + $0x174] sm:$0xf]  ;;  %v3905_v23 = vld [vmem:[%s6384_s7 + $0x110] sm:$0xf] }
 0x186   :  { %v3814_v63 = vor.u32 %v4290_v57, %v3811_v32  ;;  %v4315_v24 = vld [vmem:[%s6384_s7 + $0x114] sm:$0xf0] }
 0x187   :  { %v1334_v37 = vmax.f32 %v1325_v34, 0.0  ;;  %2462 = vmatpush.bf16.msra.mxu0 %v3794_v20  ;;  %v4283_v34 = vld [vmem:[%s6384_s7 + $0x14] sm:$0xf0]  ;;  %2473 = vmatpush.bf16.msra.mxu1 %v3882_v33 }
 0x188   :  { %v3778_v36 = vor.u32 %v4283_v34, %v3777_v62  ;;  %v4325_v62 = vld [vmem:[%s6384_s7 + $0x164] sm:$0xf0]  ;;  %v4300_v34 = vld [vmem:[%s6384_s7 + $0xa4] sm:$0xf] }
 0x189   :  { %v1338_v40 = vpack.c.bf16 %v1334_v37, %v1330_v27  ;;  %2134 = vmatpush.bf16.msrb.mxu2 %v3586_v38  ;;  %v3874_v27 = vor.u32 %v4307_v21, %v3873_v35  ;;  %v4288_v37 = vld [vmem:[%s6384_s7 + $0x44] sm:$0xf]  ;;  %v3803_v38 = vld [vmem:[%s6384_s7 + $0x48] sm:$0xf0] }
 0x18a   :  { %v4324_v21 = vld [vmem:[%s6384_s7 + $0x164] sm:$0xf] }
 0x18b   :  { %2037 = vmatmul.bf16.vlgmr.msrb.gmra.mxu3 %v1338_v40  ;;  %2463 = vmatpush.bf16.msra.mxu0 %v3786_v30  ;;  %v3955_v30 = vld [vmem:[%s6384_s7 + $0x178] sm:$0xf0] }
 0x18c   :  { %2141 = vmatpush.bf16.msrb.mxu3 %v3766_v39  ;;  %2135 = vmatmul.bf16.vlgmr.msrb.gmra.mxu2 %v5899_v53  ;;  %v3705_v53 = vld [vmem:[%s6382_s5 + $0x278] sm:$0xf]  ;;  %v3806_v39 = vor.u32 %v4288_v37, %v3803_v38  ;;  %v3958_v32 = vor.u32 %v4326_v29, %v3955_v30  ;;  %v3906_v29 = vor.u32 %v4315_v24, %v3905_v23  ;;  %v3907_v30 = vld [vmem:[%s6384_s7 + $0x118] sm:$0xf0]  ;;  %v4332_v23 = vld [vmem:[%s6386_s9 + $0x20] sm:$0xff] }
 0x18d   :  { %v3706_v55 = vor.u32 %v4264_v54, %v3705_v53  ;;  %2474 = vmatpush.bf16.msra.mxu1 %v3874_v27  ;;  %v4303_v53 = vld [vmem:[%s6384_s7 + $0xb4] sm:$0xf0]  ;;  %2486 = vmatpush.bf16.msra.mxu2 %v3954_v26  ;;  %v3947_v27 = vld [vmem:[%s6384_s7 + $0x168] sm:$0xf0]  ;;  %v4338_v24 = vld [vmem:[%s6386_s9 + $0x50] sm:$0xff] }
 0x18e   :  { %v3950_v38 = vor.u32 %v4324_v21, %v3947_v27  ;;  %v3899_v21 = vld [vmem:[%s6384_s7 + $0x108] sm:$0xf0] }
 0x18f   :  { %2464 = vmatpush.bf16.msra.mxu0 %v3778_v36  ;;  %v3851_v36 = vld [vmem:[%s6384_s7 + $0xa8] sm:$0xf0] }
 0x190   :  { %2142 = vmatpush.bf16.msrb.mxu3 %v3754_v43  ;;  %v3854_v37 = vor.u32 %v4300_v34, %v3851_v36 }
 0x191   :  { %2475 = vmatpush.bf16.msra.mxu1 %v3866_v47 }
 0x194   :  { %2143 = vmatpush.bf16.msrb.mxu3 %v3742_v46  ;;  %v3795_v46 = vld [vmem:[%s6384_s7 + $0x38] sm:$0xf0] }
 0x195   :  { %v3798_v48 = vor.u32 %v4286_v45, %v3795_v46  ;;  %v3939_v45 = vld [vmem:[%s6384_s7 + $0x158] sm:$0xf0] }
 0x198   :  { %2144 = vmatpush.bf16.msrb.mxu3 %v3730_v49  ;;  %v4310_v49 = vld [vmem:[%s6384_s7 + $0xf4] sm:$0xf] }
 0x199   :  { %v3894_v51 = vor.u32 %v4310_v49, %v3891_v50  ;;  %v6241_v49 = vld [vmem:[%s6385_s6] sm:$0x7] }
 0x19b   :  { %2093 = vmatmul.bf16.vlgmr.msra.gmra.mxu3 %v1338_v40 }
 0x19c   :  { %2145 = vmatpush.bf16.msrb.mxu3 %v3718_v52  ;;  %v3857_v52 = vld [vmem:[%s6384_s7 + $0xb0] sm:$0xf] }
 0x19d   :  { %v3858_v54 = vor.u32 %v4303_v53, %v3857_v52  ;;  %v4321_v52 = vld [vmem:[%s6384_s7 + $0x144] sm:$0xf0]  ;;  %v4296_v53 = vld [vmem:[%s6384_s7 + $0x84] sm:$0xf] }
 0x19f   :  { %2476 = vmatpush.bf16.msra.mxu1 %v3858_v54 }
 0x1a0   :  { %2146 = vmatpush.bf16.msrb.mxu3 %v3706_v55  ;;  %v4284_v55 = vld [vmem:[%s6384_s7 + $0x24] sm:$0xf] }
 0x1a4   :  { %2147 = vmatpush.bf16.msrb.mxu3 %v3694_v59  ;;  %v3790_v59 = vor.u32 %v4284_v55, %v3787_v56  ;;  %v3835_v55 = vld [vmem:[%s6384_s7 + $0x88] sm:$0xf0]  ;;  %v4320_v56 = vld [vmem:[%s6384_s7 + $0x144] sm:$0xf] }
 0x1a5   :  { %v3838_v60 = vor.u32 %v4296_v53, %v3835_v55 }
 0x1a8   :  { %2148 = vmatpush.bf16.msrb.mxu3 %v3682_v0  ;;  %v3849_v0 = vld [vmem:[%s6384_s7 + $0xa0] sm:$0xf] }
 0x1a9   :  { %v3850_v1 = vor.u32 %v4301_v12, %v3849_v0  ;;  %v1469_v0 = vperm.slane %v6241_v49, 0  ;;  %v3921_v12 = vld [vmem:[%s6384_s7 + $0x130] sm:$0xf] }
 0x1ab   :  { %2149 = vmatmul.bf16.vlgmr.msrb.gmra.mxu3 %v1338_v40  ;;  %v3769_v40 = vld [vmem:[%s6384_s7] sm:$0xf]  ;;  %2477 = vmatpush.bf16.msra.mxu1 %v3850_v1  ;;  %v4319_v1 = vld [vmem:[%s6384_s7 + $0x134] sm:$0xf0] }
 0x1ac   :  { %2500 = vmatpush.bf16.msra.mxu3 %v3830_v16  ;;  %v3770_v43 = vor.u32 %v4281_v41, %v3769_v40  ;;  %v3867_v16 = vld [vmem:[%s6384_s7 + $0xc8] sm:$0xf0]  ;;  %v4323_v40 = vld [vmem:[%s6384_s7 + $0x154] sm:$0xf0]  ;;  %v4298_v41 = vld [vmem:[%s6384_s7 + $0x94] sm:$0xf]  ;;  %v3922_v4 = vor.u32 %v4319_v1, %v3921_v12 }
 0x1ad   :  { %v3870_v17 = vor.u32 %v4304_v3, %v3867_v16  ;;  %v3915_v16 = vld [vmem:[%s6384_s7 + $0x128] sm:$0xf0] }
 0x1ae   :  { %2465 = vmatpush.bf16.msra.mxu0 %v3770_v43  ;;  %v3843_v43 = vld [vmem:[%s6384_s7 + $0x98] sm:$0xf0]  ;;  %v3918_v18 = vor.u32 %v4316_v13, %v3915_v16 }
 0x1af   :  { %2478 = vmatpush.bf16.msra.mxu1 %v3842_v11  ;;  %v3846_v47 = vor.u32 %v4298_v41, %v3843_v43  ;;  %v4317_v11 = vld [vmem:[%s6384_s7 + $0x124] sm:$0xf0]  ;;  %v4335_v16 = vld [vmem:[%s6386_s9 + $0x38] sm:$0xff] }
 0x1b0   :  { %2501 = vmatpush.bf16.msra.mxu3 %v3822_v25  ;;  %v4302_v25 = vld [vmem:[%s6384_s7 + $0xb4] sm:$0xf] }
 0x1b1   :  { %v3862_v57 = vor.u32 %v4302_v25, %v3859_v28  ;;  %v4314_v25 = vld [vmem:[%s6384_s7 + $0x114] sm:$0xf] }
 0x1b2   :  { %2514 = vmatpush.bf16.msrb.mxu0 %v3894_v51  ;;  %v3929_v51 = vld [vmem:[%s6384_s7 + $0x140] sm:$0xf] }
 0x1b3   :  { %2479 = vmatpush.bf16.msra.mxu1 %v3834_v22  ;;  %v3930_v54 = vor.u32 %v4321_v52, %v3929_v51 }
 0x1b4   :  { %2502 = vmatpush.bf16.msra.mxu3 %v3814_v63  ;;  %v3945_v63 = vld [vmem:[%s6384_s7 + $0x160] sm:$0xf] }
 0x1b5   :  { %v3946_v35 = vor.u32 %v4325_v62, %v3945_v63  ;;  %v4313_v63 = vld [vmem:[%s6384_s7 + $0x104] sm:$0xf0]  ;;  %v4312_v62 = vld [vmem:[%s6384_s7 + $0x104] sm:$0xf] }
 0x1b6   :  { %2515 = vmatpush.bf16.msrb.mxu0 %v3886_v61  ;;  %v3934_v61 = vor.u32 %v4320_v56, %v3931_v58 }
 0x1b7   :  { %2528 = vmatpush.bf16.msrb.mxu1 %v3958_v32  ;;  %2487 = vmatpush.bf16.msra.mxu2 %v3946_v35 }
 0x1b8   :  { %2503 = vmatpush.bf16.msra.mxu3 %v3806_v39  ;;  %v3937_v39 = vld [vmem:[%s6384_s7 + $0x150] sm:$0xf] }
 0x1b9   :  { %v3938_v42 = vor.u32 %v4323_v40, %v3937_v39 }
 0x1ba   :  { %2516 = vmatpush.bf16.msrb.mxu0 %v3878_v8 }
 0x1bb   :  { %2529 = vmatpush.bf16.msrb.mxu1 %v3950_v38  ;;  %2488 = vmatpush.bf16.msra.mxu2 %v3938_v42  ;;  %v1470_v38 = vperm.slane %v6241_v49, 1 }
 0x1bc   :  { %2504 = vmatpush.bf16.msra.mxu3 %v3798_v48  ;;  %v3942_v48 = vor.u32 %v4322_v44, %v3939_v45 }
 0x1be   :  { %2517 = vmatpush.bf16.msrb.mxu0 %v3870_v17 }
 0x1bf   :  { %2530 = vmatpush.bf16.msrb.mxu1 %v3942_v48  ;;  %2489 = vmatpush.bf16.msra.mxu2 %v3930_v54 }
 0x1c0   :  { %2505 = vmatpush.bf16.msra.mxu3 %v3790_v59 }
 0x1c2   :  { %2518 = vmatpush.bf16.msrb.mxu0 %v3862_v57  ;;  %v3910_v57 = vor.u32 %v4314_v25, %v3907_v30  ;;  %v4331_v25 = vld [vmem:[%s6386_s9 + $0x18] sm:$0xff]  ;;  %v4336_v30 = vld [vmem:[%s6386_s9 + $0x40] sm:$0xff] }
 0x1c3   :  { %2531 = vmatpush.bf16.msrb.mxu1 %v3934_v61  ;;  %2490 = vmatpush.bf16.msra.mxu2 %v3922_v4 }
 0x1c4   :  { %2506 = vmatpush.bf16.msra.mxu3 %v3782_v6 }
 0x1c6   :  { %2519 = vmatpush.bf16.msrb.mxu0 %v3854_v37  ;;  %v3902_v37 = vor.u32 %v4312_v62, %v3899_v21 }
 0x1c7   :  { %2532 = vmatpush.bf16.msrb.mxu1 %v3926_v7 }
 0x1c8   :  { %2507 = vmatpush.bf16.msra.mxu3 %v3774_v15  ;;  %v6178_v20 = vpop.f32.mrf.mxu0  ;;  %v3914_v15 = vor.u32 %v4317_v11, %v3913_v10 }
 0x1c9   :  { %v1997_v8 = vadd.f32 %v6178_v20, %v1469_v0 }
 0x1ca   :  { %2520 = vmatpush.bf16.msrb.mxu0 %v3846_v47  ;;  %2491 = vmatpush.bf16.msra.mxu2 %v3914_v15  ;;  %v4342_v15 = vld [vmem:[%s6386_s9 + $0x70] sm:$0xff] }
 0x1cb   :  { %2533 = vmatpush.bf16.msrb.mxu1 %v3918_v18  ;;  %v4334_v18 = vld [vmem:[%s6386_s9 + $0x30] sm:$0xff] }
 0x1ce   :  { %2521 = vmatpush.bf16.msrb.mxu0 %v3838_v60  ;;  %2492 = vmatpush.bf16.msra.mxu2 %v3906_v29  ;;  %v4330_v29 = vld [vmem:[%s6386_s9 + $0x10] sm:$0xff] }
 0x1cf   :  { %2534 = vmatpush.bf16.msrb.mxu1 %v3910_v57 }
 0x1d0   :  { %v1998_v46 = vpop.f32.mrf.mxu0 }
 0x1d1   :  { %v1999_v14 = vadd.f32 %v1998_v46, %v1469_v0 }
 0x1d3   :  { %2535 = vmatpush.bf16.msrb.mxu1 %v3902_v37 }
 0x1d8   :  { %v6198_v31 = vpop.f32.mrf.mxu1  ;;  %v2052_v9 = vpop.f32.mrf.mxu0 }
 0x1d9   :  { %v2011_v3 = vadd.f32 %v6198_v31, %v1997_v8  ;;  %v2053_v43 = vadd.f32 %v2052_v9, %v1470_v38 }
 0x1e0   :  { %v2012_v50 = vpop.f32.mrf.mxu1  ;;  %v2054_v27 = vpop.f32.mrf.mxu0 }
 0x1e1   :  { %v2013_v19 = vadd.f32 %v2012_v50, %v1999_v14  ;;  %v2055_v44 = vadd.f32 %v2054_v27, %v1470_v38 }
 0x1e8   :  { %v2066_v17 = vpop.f32.mrf.mxu1  ;;  %v2108_v48 = vpop.f32.mrf.mxu0 }
 0x1e9   :  { %v2067_v45 = vadd.f32 %v2066_v17, %v2053_v43  ;;  %v4341_v17 = vld [vmem:[%s6386_s9 + $0x68] sm:$0xff] }
 0x1ef   :  { %v6200_v33 = vpop.f32.mrf.mxu2 }
 0x1f0   :  { %v2025_v20 = vadd.f32 %v6200_v33, %v2011_v3  ;;  %v3897_v33 = vld [vmem:[%s6384_s7 + $0x100] sm:$0xf]  ;;  %v2068_v40 = vpop.f32.mrf.mxu1  ;;  %v2110_v61 = vpop.f32.mrf.mxu0 }
 0x1f1   :  { %v3898_v36 = vor.u32 %v4313_v63, %v3897_v33  ;;  %v2069_v46 = vadd.f32 %v2068_v40, %v2055_v44  ;;  %v4328_v33 = vld [vmem:[%s6386_s9] sm:$0xff] }
 0x1f3   :  { %2493 = vmatpush.bf16.msra.mxu2 %v3898_v36 }
 0x1f7   :  { %v2026_v59 = vpop.f32.mrf.mxu2  ;;  %2680 = vmatpush.bf16.msrb.mxu2 %v4335_v16 }
 0x1f8   :  { %v2027_v26 = vadd.f32 %v2026_v59, %v2013_v19  ;;  %v2122_v52 = vpop.f32.mrf.mxu1  ;;  %v1471_v59 = vperm.slane %v6241_v49, 2  ;;  %v4343_v49 = vld [vmem:[%s6386_s9 + $0x78] sm:$0xff]  ;;  %v4340_v19 = vld [vmem:[%s6386_s9 + $0x60] sm:$0xff] }
 0x1f9   :  { %2694 = vmatpush.bf16.msrb.mxu3 %v4343_v49  ;;  %v2711_v49 = vld [vmem:[%s6390_s11] sm:$0x1] }
 0x1fa   :  { %v2109_v12 = vadd.f32 %v2108_v48, %v1471_v59  ;;  %v2111_v2 = vadd.f32 %v2110_v61, %v1471_v59 }
 0x1fb   :  { %2681 = vmatpush.bf16.msrb.mxu2 %v4334_v18 }
 0x1fc   :  { %v2123_v4 = vadd.f32 %v2122_v52, %v2109_v12  ;;  %v4349_v12 = vmov 0  }
 0x1fd   :  { %2695 = vmatpush.bf16.msrb.mxu3 %v4342_v15  ;;  %4345 = vset.pattern.permute.xlu0 %v4349_v12 }
 0x1ff   :  { %v2080_v22 = vpop.f32.mrf.mxu2 }
 0x200   :  { %v2081_v47 = vadd.f32 %v2080_v22, %v2067_v45  ;;  %v2124_v1 = vpop.f32.mrf.mxu1  ;;  %v4339_v22 = vld [vmem:[%s6386_s9 + $0x58] sm:$0xff] }
 0x201   :  { %2696 = vmatpush.bf16.msrb.mxu3 %v4341_v17 }
 0x205   :  { %2697 = vmatpush.bf16.msrb.mxu3 %v4340_v19 }
 0x207   :  { %v2082_v41 = vpop.f32.mrf.mxu2 }
 0x208   :  { %v2083_v50 = vadd.f32 %v2082_v41, %v2069_v46 }
 0x209   :  { %2698 = vmatpush.bf16.msrb.mxu3 %v4339_v22 }
 0x20d   :  { %2699 = vmatpush.bf16.msrb.mxu3 %v4338_v24 }
 0x20e   :  { %v2038_v6 = vpop.f32.mrf.mxu3 }
 0x20f   :  { %v2039_v28 = vadd.f32 %v2038_v6, %v2025_v20  ;;  %v2136_v55 = vpop.f32.mrf.mxu2  ;;  %v2125_v6 = vadd.f32 %v2124_v1, %v2111_v2  ;;  %v4333_v20 = vld [vmem:[%s6386_s9 + $0x28] sm:$0xff] }
 0x210   :  { %v2137_v7 = vadd.f32 %v2136_v55, %v2123_v4  ;;  %2682 = vmatpush.bf16.msrb.mxu2 %v4333_v20 }
 0x211   :  { %v2155_v34 = vmax.f32 %v2039_v28, 0.0  ;;  %v4337_v28 = vld [vmem:[%s6386_s9 + $0x48] sm:$0xff] }
 0x212   :  { %2700 = vmatpush.bf16.msrb.mxu3 %v4337_v28 }
 0x214   :  { %2683 = vmatpush.bf16.msrb.mxu2 %v4332_v23 }
 0x216   :  { %v2040_v31 = vpop.f32.mrf.mxu3  ;;  %2701 = vmatpush.bf16.msrb.mxu3 %v4336_v30 }
 0x217   :  { %v2041_v32 = vadd.f32 %v2040_v31, %v2027_v26  ;;  %v2138_v5 = vpop.f32.mrf.mxu2  ;;  %v4329_v31 = vld [vmem:[%s6386_s9 + $0x8] sm:$0xff] }
 0x218   :  { %v2139_v8 = vadd.f32 %v2138_v5, %v2125_v6  ;;  %2684 = vmatpush.bf16.msrb.mxu2 %v4331_v25  ;;  %v4346_v5 = vld [vmem:[%s6388_s10] ss:$0 sm:$0xff] }
 0x219   :  { %v2158_v35 = vmax.f32 %v2041_v32, 0.0 }
 0x21b   :  { %v2161_v39 = vpack.c.bf16 %v2158_v35, %v2155_v34  ;;  %v2212_v35 = vld [vmem:[%s6387_s8] sm:$0x3] }
 0x21c   :  { %2685 = vmatpush.bf16.msrb.mxu2 %v4330_v29  ;;  %v2215_v36 = vperm.slane %v2212_v35, 1 }
 0x21d   :  { %2466 = vmatmul.bf16.vlgmr.msra.gmra.mxu0 %v2161_v39  ;;  %2508 = vmatmul.bf16.vlgmr.msra.gmra.mxu3 %v2161_v39  ;;  %v2214_v39 = vperm.slane %v2212_v35, 0 }
 0x21e   :  { %v2094_v42 = vpop.f32.mrf.mxu3 }
 0x21f   :  { %v2095_v51 = vadd.f32 %v2094_v42, %v2081_v47 }
 0x220   :  { %2686 = vmatpush.bf16.msrb.mxu2 %v4329_v31 }
 0x221   :  { %v2156_v56 = vmax.f32 %v2095_v51, 0.0 }
 0x224   :  { %2687 = vmatpush.bf16.msrb.mxu2 %v4328_v33 }
 0x226   :  { %v2096_v53 = vpop.f32.mrf.mxu3 }
 0x227   :  { %v2097_v54 = vadd.f32 %v2096_v53, %v2083_v50 }
 0x229   :  { %v2159_v58 = vmax.f32 %v2097_v54, 0.0 }
 0x22b   :  { %v2162_v60 = vpack.c.bf16 %v2159_v58, %v2156_v56 }
 0x22d   :  { %2480 = vmatmul.bf16.vlgmr.msra.gmra.mxu1 %v2162_v60  ;;  %2522 = vmatmul.bf16.vlgmr.msrb.gmra.mxu0 %v2162_v60 }
 0x22e   :  { %v2150_v0 = vpop.f32.mrf.mxu3 }
 0x22f   :  { %v2151_v9 = vadd.f32 %v2150_v0, %v2137_v7  ;;  %v18_v0 = vstv %s6389_s12 }
 0x230   :  { %19 = vst [vmem:[#allocation2] sm:$0x1] %v18_v0 }
 0x231   :  { %v2157_v13 = vmax.f32 %v2151_v9, 0.0 }
 0x236   :  { %v2152_v10 = vpop.f32.mrf.mxu3 }
 0x237   :  { %v2153_v11 = vadd.f32 %v2152_v10, %v2139_v8  ;;  %v2712_v4 = vld [vmem:[#allocation2] sm:$0x1] }
 0x238   :  { %2715 = vperm.xlu0 %4345, %v2712_v4  }
 0x239   :  { %v2160_v14 = vmax.f32 %v2153_v11, 0.0 }
 0x23b   :  { %v2163_v3 = vpack.c.bf16 %v2160_v14, %v2157_v13 }
 0x23d   :  { %2494 = vmatmul.bf16.vlgmr.msra.gmra.mxu2 %v2163_v3  ;;  %2536 = vmatmul.bf16.vlgmr.msrb.gmra.mxu1 %v2163_v3 }
 0x29a   :  { %v2467_v26 = vpop.f32.mrf.mxu0 }
 0x29b   :  { %v2468_v46 = vadd.f32 %v2467_v26, %v2214_v39 }
 0x2a0   :  { %v2509_v63 = vpop.f32.mrf.mxu3 }
 0x2a1   :  { %v2510_v37 = vadd.f32 %v2509_v63, %v2215_v36 }
 0x2a2   :  { %v2469_v57 = vpop.f32.mrf.mxu0 }
 0x2a3   :  { %v2470_v48 = vadd.f32 %v2469_v57, %v2214_v39 }
 0x2a8   :  { %v2511_v27 = vpop.f32.mrf.mxu3 }
 0x2a9   :  { %v2512_v40 = vadd.f32 %v2511_v27, %v2215_v36 }
 0x2aa   :  { %v2481_v32 = vpop.f32.mrf.mxu1  ;;  %v2523_v34 = vpop.f32.mrf.mxu0 }
 0x2ab   :  { %v2524_v41 = vadd.f32 %v2523_v34, %v2510_v37  ;;  %v2482_v50 = vadd.f32 %v2481_v32, %v2468_v46  ;;  %v2716_v15 = vpop.permute.xlu0 %2715 }
 0x2ac   :  { %v2718_v16 = vperm.slane %v2716_v15, 0 }
 0x2b2   :  { %v2483_v62 = vpop.f32.mrf.mxu1  ;;  %v2525_v38 = vpop.f32.mrf.mxu0 }
 0x2b3   :  { %v2526_v43 = vadd.f32 %v2525_v38, %v2512_v40  ;;  %v2484_v53 = vadd.f32 %v2483_v62, %v2470_v48 }
 0x2ba   :  { %v2537_v21 = vpop.f32.mrf.mxu1 }
 0x2bb   :  { %v2538_v44 = vadd.f32 %v2537_v21, %v2524_v41 }
 0x2bd   :  { %v2543_v51 = vmax.f32 %v2538_v44, 0.0 }
 0x2c0   :  { %v2495_v42 = vpop.f32.mrf.mxu2 }
 0x2c1   :  { %v2496_v54 = vadd.f32 %v2495_v42, %v2482_v50 }
 0x2c2   :  { %v2539_v45 = vpop.f32.mrf.mxu1 }
 0x2c3   :  { %v2540_v47 = vadd.f32 %v2539_v45, %v2526_v43  ;;  %v2542_v59 = vmax.f32 %v2496_v54, 0.0 }
 0x2c5   :  { %v2545_v52 = vmax.f32 %v2540_v47, 0.0 }
 0x2c7   :  { %v2547_v55 = vpack.c.bf16 %v2545_v52, %v2543_v51 }
 0x2c8   :  { %v2497_v56 = vpop.f32.mrf.mxu2 }
 0x2c9   :  { %v2498_v58 = vadd.f32 %v2497_v56, %v2484_v53  ;;  %2702 = vmatmul.bf16.vlgmr.msrb.gmra.mxu3 %v2547_v55 }
 0x2cb   :  { %v2544_v60 = vmax.f32 %v2498_v58, 0.0 }
 0x2cd   :  { %v2546_v61 = vpack.c.bf16 %v2544_v60, %v2542_v59 }
 0x2cf   :  { %2688 = vmatmul.bf16.vlgmr.msrb.gmra.mxu2 %v2546_v61 }
 0x34c   :  { %v2703_v1 = vpop.f32.mrf.mxu3 }
 0x352   :  { %v2689_v2 = vpop.f32.mrf.mxu2 }
 0x353   :  { %v2690_v6 = vadd.f32 %v4346_v5, %v2689_v2 }
 0x354   :  { %v2705_v10 = vpop.f32.mrf.mxu3 }
 0x355   :  { %v2704_v8 = vadd.f32 %v2703_v1, %v2690_v6 }
 0x357   :  { %v2708_v13 = vmax.f32 %v2704_v8, 0.0 }
 0x35a   :  { %v2691_v7 = vpop.f32.mrf.mxu2 }
 0x35b   :  { %v2692_v9 = vadd.f32 %v4346_v5, %v2691_v7 }
 0x35d   :  { %v2706_v11 = vadd.f32 %v2705_v10, %v2692_v9 }
 0x35f   :  { %v2709_v14 = vmax.f32 %v2706_v11, 0.0 }
 0x361   :  { %v2710_v3 = vpack.c.bf16 %v2709_v14, %v2708_v13 }
 0x363   :  { %2726 = vmatpush.bf16.xpose.msra.mxu0 %v2710_v3 }
 0x36a   :  { %2727 = vmatmul.bf16.vlgmr.msra.gmra.mxu0 %v2711_v49 }
 0x3e7   :  { %v2728_v17 = vpop.f32.mrf.mxu0 }
 0x3e8   :  { %v2729_v18 = vadd.f32 %v2728_v17, %v2718_v16 }
 0x3ea   :  { %4347 = vtanh.f32 %v2729_v18 }
 0x3ef   :  { %v2730_v19 = vpop.f32.mrf.mxu0 }
 0x3f0   :  { %v4348_v20 = vpop.eup %4347 }
 0x3f1   :  { %2734 = vst.msk [vmem:[%s6391_s13] sm:$0x1] %vm2733_vm0, %v4348_v20 }

</bundles_post_ra>
